<compile_context>
chip_gen: v6e
topology: v6e:2x2x1
jax: 0.10.0
libtpu: 0.0.40
codegen_flags: <defaults>
</compile_context>

<pallas_src>
import functools

import jax
import jax.numpy as jnp
from jax import lax
from jax.experimental import pallas as pl
from jax.experimental.pallas import tpu as pltpu


# ----------------------------------------------------------------------------
# Fused whole-network kernel builder.
# ----------------------------------------------------------------------------
def _make_fused_kernel(layer_descs, Hc, Wc, compute_dtype):
    """layer_descs: static list of dicts describing each layer.
    Activations inside the kernel are (C, nPhases * S) with S = Hc * Wc."""
    S = Hc * Wc
    halo = Wc + 1          # covers coarse shifts in [-(Wc+1), Wc+1]

    def kernel(x_ref, ij_ref, *rest):
        wb = rest[:-1]                      # (w0, b0, w1, b1, ..., wh, bh)
        out_ref = rest[-1]

        i_idx = ij_ref[0:1, :]              # (1, S) int32 coarse row index
        j_idx = ij_ref[1:2, :]              # (1, S) int32 coarse col index

        def valid_mask(sr, sc):
            """Boolean (1, S) mask of coarse positions whose shifted read is
            in-bounds, or None if no masking is needed."""
            m = None
            if sr == -1:
                m = i_idx >= 1
            elif sr == 1:
                m = i_idx <= Hc - 2
            if sc == -1:
                mc = j_idx >= 1
                m = mc if m is None else jnp.logical_and(m, mc)
            elif sc == 1:
                mc = j_idx <= Wc - 2
                m = mc if m is None else jnp.logical_and(m, mc)
            return m

        x = x_ref[0]                        # (C0, nP0 * S), compute dtype
        wi = 0
        for d in layer_descs:
            if d['op'] == 'pool':
                # MaxPool2d(2, 2): max over 4 input phase slices per output
                # phase -- pure VPU, no shifts, no masks, no matmul.
                f_in = d['f_in']
                f_out = f_in // 2
                outs = []
                for a in range(f_out):
                    for b in range(f_out):
                        m = None
                        for u in range(2):
                            for v in range(2):
                                P = (2 * a + u) * f_in + (2 * b + v)
                                sl = x[:, P * S:(P + 1) * S]
                                m = sl if m is None else jnp.maximum(m, sl)
                        outs.append(m)
                x = outs[0] if len(outs) == 1 else jnp.concatenate(outs, axis=1)
                continue

            # ---- 3x3 conv (stride 1 or 2) as ONE polyphase MXU matmul ----
            w_ref, b_ref = wb[wi], wb[wi + 1]
            wi += 2
            stride, f_in = d['stride'], d['f_in']
            f_out = f_in // stride
            Cin = x.shape[0]

            xc = x.astype(compute_dtype)
            zpad = jnp.zeros((Cin, halo), compute_dtype)
            xp = jnp.concatenate([zpad, xc, zpad], axis=1)

            tap_blocks = []
            for kh in range(3):
                for kw in range(3):
                    dh, dw = kh - 1, kw - 1
                    cols = []
                    for a in range(f_out):          # output row phase
                        tr = stride * a + dh
                        p_r, s_r = tr % f_in, tr // f_in
                        for b in range(f_out):      # output col phase
                            tc = stride * b + dw
                            p_c, s_c = tc % f_in, tc // f_in
                            P = p_r * f_in + p_c
                            off = halo + P * S + s_r * Wc + s_c
                            sl = xp[:, off:off + S]
                            vm = valid_mask(s_r, s_c)
                            if vm is not None:
                                sl = jnp.where(vm, sl, 0)
                            cols.append(sl)
                    tap_blocks.append(cols[0] if len(cols) == 1
                                      else jnp.concatenate(cols, axis=1))
            patches = jnp.concatenate(tap_blocks, axis=0)   # (9*Cin, nPout*S)

            y = jnp.dot(w_ref[...], patches,
                        preferred_element_type=jnp.float32)
            y = y + b_ref[...]                               # (Cout, nPout*S)

            if d['norm'] == 'instancenorm':
                # per-channel stats over all phases * coarse = full spatial
                mu = jnp.mean(y, axis=1, keepdims=True)
                yc = y - mu
                var = jnp.mean(yc * yc, axis=1, keepdims=True)
                y = yc * lax.rsqrt(var + 1e-5)

            if d['act'] == 'leakyrelu':
                y = jnp.maximum(y, 0.2 * y)
            elif d['act'] == 'relu':
                y = jnp.maximum(y, 0.0)

            if d['head_oc'] is not None:
                # loc rows stay, log_scale rows get a numerically stable
                # softplus; selected by a row-iota mask (no mid-sublane slice).
                oc = d['head_oc']
                row = lax.broadcasted_iota(jnp.int32, y.shape, 0)
                sp = (jnp.maximum(y, 0.0)
                      + jnp.log(1.0 + jnp.exp(-jnp.abs(y))))
                y = jnp.where(row < oc, y, sp)

            x = y

        out_ref[0] = x.astype(jnp.float32)

    return kernel


# ----------------------------------------------------------------------------
# SimpleParamNet: init + fused Pallas forward + pure-JAX reference.
# ----------------------------------------------------------------------------
def init_simple_param_net(key, structure, in_channels, out_channels, scale=2):
    """Mirrors SimpleParamNet.__init__ with a deterministic synthetic init."""
    plan = []        # static layer plan: ('pool'|'conv'|'plain', weight index)
    weights = []     # [(w_oihw, bias), ...]
    c = in_channels
    keys = jax.random.split(key, len(structure) + 1)

    def conv_init(k, cin, cout):
        kw, kb = jax.random.split(k)
        bound = 1.0 / float((cin * 9) ** 0.5)   # torch Conv2d default init scale
        w = jax.random.uniform(kw, (cout, cin, 3, 3), jnp.float32, -bound, bound)
        b = jax.random.uniform(kb, (cout,), jnp.float32, -bound, bound)
        return w, b

    for i, item in enumerate(structure):
        if item == 'pool':
            plan.append(('pool', None))
        elif item == 'conv':
            cc = int(scale * c)
            weights.append(conv_init(keys[i], c, cc))
            plan.append(('conv', len(weights) - 1))    # stride-2 conv
            c = cc
        else:
            weights.append(conv_init(keys[i], c, int(item)))
            plan.append(('plain', len(weights) - 1))   # stride-1 conv
            c = int(item)
    head = conv_init(keys[-1], c, 2 * out_channels)
    return tuple(plan), {'convs': weights, 'head': head}


def simple_param_net_forward(params, x, *, plan, out_channels,
                             norm_type='instancenorm', non_lin='leakyrelu',
                             compute_dtype=jnp.bfloat16):
    """Fused Pallas forward: NCHW in, (loc, scale) NCHW out."""
    if norm_type not in ('instancenorm', 'none'):
        # TODO(synk): training-mode BatchNorm2d not implemented in Pallas path.
        raise NotImplementedError("norm_type='batchnorm' not implemented")

    B, C, H, W = x.shape
    n_down = sum(1 for kind, _ in plan if kind in ('pool', 'conv'))
    F0 = 2 ** n_down
    assert H % F0 == 0 and W % F0 == 0, (
        f"spatial dims ({H},{W}) must be divisible by 2**{n_down}={F0} "
        f"(one factor of 2 per downsampling layer)")
    Hc, Wc = H // F0, W // F0
    S = Hc * Wc

    def pack_conv(w, b):
        # (O, I, 3, 3) -> (O, 9*I) tap-major; K = 9*I exactly (no per-tap pad).
        O, I = w.shape[0], w.shape[1]
        w2 = jnp.transpose(w, (0, 2, 3, 1)).reshape(O, 9 * I).astype(compute_dtype)
        b2 = b.reshape(O, 1).astype(jnp.float32)
        return w2, b2

    # Static layer descriptors (the kernel is specialized on these).
    layer_descs, operands = [], []
    level = n_down
    for kind, idx in plan:
        if kind == 'pool':
            layer_descs.append(dict(op='pool', f_in=2 ** level))
            level -= 1
        else:
            stride = 2 if kind == 'conv' else 1
            layer_descs.append(dict(op='conv', stride=stride, f_in=2 ** level,
                                    norm=norm_type, act=non_lin, head_oc=None))
            w2, b2 = pack_conv(*params['convs'][idx])
            operands += [w2, b2]
            if stride == 2:
                level -= 1
    assert level == 0
    layer_descs.append(dict(op='conv', stride=1, f_in=1, norm='none',
                            act='none', head_oc=out_channels))
    w2, b2 = pack_conv(*params['head'])
    operands += [w2, b2]

    # One-time space-to-depth of the (tiny) network input; all later
    # activations stay inside the single kernel.
    xs = x.reshape(B, C, Hc, F0, Wc, F0)
    xs = jnp.transpose(xs, (0, 1, 3, 5, 2, 4)).reshape(B, C, F0 * F0 * S)
    xs = xs.astype(compute_dtype)

    # Coarse (row, col) indices for the in-kernel boundary masks (128 bytes).
    fidx = jnp.arange(S, dtype=jnp.int32)
    ij = jnp.stack([fidx // Wc, fidx % Wc], axis=0)

    Lin = F0 * F0 * S
    in_specs = [pl.BlockSpec((1, C, Lin), lambda b: (b, 0, 0)),
                pl.BlockSpec((2, S), lambda b: (0, 0))]
    for op in operands:
        in_specs.append(pl.BlockSpec(op.shape, lambda b: (0, 0)))

    out_c = 2 * out_channels
    kernel = _make_fused_kernel(layer_descs, Hc, Wc, compute_dtype)

    out = pl.pallas_call(
        kernel,
        out_shape=jax.ShapeDtypeStruct((B, out_c, S), jnp.float32),
        grid_spec=pltpu.PrefetchScalarGridSpec(
            num_scalar_prefetch=0,
            grid=(B,),
            in_specs=in_specs,
            out_specs=pl.BlockSpec((1, out_c, S), lambda b: (b, 0, 0))),
        compiler_params=pltpu.CompilerParams(
            dimension_semantics=("parallel",)),
    )(xs, ij, *operands)

    out = out.reshape(B, out_c, Hc, Wc)
    return out[:, :out_channels], out[:, out_channels:]


def reference_forward(params, x, *, plan, out_channels,
                      norm_type='instancenorm', non_lin='leakyrelu'):
    """Pure-JAX reference matching the torch module (for validation)."""
    def act(v):
        if non_lin == 'leakyrelu':
            return jnp.where(v >= 0, v, 0.2 * v)
        return jnp.maximum(v, 0.0)

    def norm(v):
        if norm_type == 'instancenorm':
            mu = v.mean(axis=(2, 3), keepdims=True)
            var = ((v - mu) ** 2).mean(axis=(2, 3), keepdims=True)
            return (v - mu) * lax.rsqrt(var + 1e-5)
        return v

    def conv(v, w, b, stride):
        y = lax.conv_general_dilated(
            v, w, (stride, stride), ((1, 1), (1, 1)),
            dimension_numbers=('NCHW', 'OIHW', 'NCHW'))
        return y + b[None, :, None, None]

    h = x
    for kind, idx in plan:
        if kind == 'pool':
            h = lax.reduce_window(h, -jnp.inf, lax.max,
                                  (1, 1, 2, 2), (1, 1, 2, 2), 'VALID')
        else:
            w, b = params['convs'][idx]
            h = act(norm(conv(h, w, b, 2 if kind == 'conv' else 1)))
    wp, bp = params['head']
    y = conv(h, wp, bp, 1)
    loc, log_scale = jnp.split(y, 2, axis=1)
    return loc, jax.nn.softplus(log_scale)


if __name__ == "__main__":
    B, Cin, H, W = 2, 4, 16, 16
    out_channels = 4
    structure = ('conv', 8, 'pool')       # stride-2 conv, 3x3 conv, maxpool
    norm_type, non_lin = 'instancenorm', 'leakyrelu'

    key = jax.random.PRNGKey(0)
    pkey, xkey = jax.random.split(key)
    plan, params = init_simple_param_net(pkey, structure, Cin, out_channels)
    x = jax.random.normal(xkey, (B, Cin, H, W), jnp.float32)

    fwd = functools.partial(simple_param_net_forward, plan=plan,
                            out_channels=out_channels, norm_type=norm_type,
                            non_lin=non_lin)

    loc_r, scale_r = reference_forward(params, x, plan=plan,
                                       out_channels=out_channels,
                                       norm_type=norm_type, non_lin=non_lin)

    # f32-operand path: validation against the pure-JAX reference
    # (default MXU precision, so a 1e-3 tolerance rather than bit-exact).
    loc32, scale32 = jax.jit(
        functools.partial(fwd, compute_dtype=jnp.float32))(params, x)
    jax.block_until_ready((loc32, scale32))
    assert loc32.shape == loc_r.shape and scale32.shape == scale_r.shape
    assert jnp.allclose(loc32, loc_r, atol=1e-3, rtol=1e-3)
    assert jnp.allclose(scale32, scale_r, atol=1e-3, rtol=1e-3)

    # bf16-MXU-operand path (the performance configuration): relaxed check.
    loc16, scale16 = jax.jit(
        functools.partial(fwd, compute_dtype=jnp.bfloat16))(params, x)
    jax.block_until_ready((loc16, scale16))
    assert jnp.allclose(loc16, loc_r, atol=1e-1, rtol=1e-1)
    assert jnp.allclose(scale16, scale_r, atol=1e-1, rtol=1e-1)

    print("KERNEL_OK")
</pallas_src>

<mosaic_0001>
module attributes {stable_mosaic.version = 11 : i64} {
  func.func @kernel(%arg0: i32, %arg1: memref<1x4x256xf32, #tpu.memory_space<vmem>>, %arg2: memref<2x16xi32, #tpu.memory_space<vmem>>, %arg3: memref<8x36xf32, #tpu.memory_space<vmem>>, %arg4: memref<8x1xf32, #tpu.memory_space<vmem>>, %arg5: memref<8x72xf32, #tpu.memory_space<vmem>>, %arg6: memref<8x1xf32, #tpu.memory_space<vmem>>, %arg7: memref<8x72xf32, #tpu.memory_space<vmem>>, %arg8: memref<8x1xf32, #tpu.memory_space<vmem>>, %arg9: memref<1x8x16xf32, #tpu.memory_space<vmem>>) attributes {dimension_semantics = [#tpu.dimension_semantics<parallel>], iteration_bounds = array<i64: 2>, scalar_prefetch = 0 : i64, scratch_operands = 0 : i64, tpu.core_type = #tpu.core_type<tc>, window_params = [{transform_indices = @transform_0, window_bounds = array<i64: 1, 4, 256>}, {pipeline_mode = #tpu.pipeline_mode<synchronous>, transform_indices = @transform_1, window_bounds = array<i64: 2, 16>}, {pipeline_mode = #tpu.pipeline_mode<synchronous>, transform_indices = @transform_2, window_bounds = array<i64: 8, 36>}, {pipeline_mode = #tpu.pipeline_mode<synchronous>, transform_indices = @transform_3, window_bounds = array<i64: 8, 1>}, {pipeline_mode = #tpu.pipeline_mode<synchronous>, transform_indices = @transform_4, window_bounds = array<i64: 8, 72>}, {pipeline_mode = #tpu.pipeline_mode<synchronous>, transform_indices = @transform_5, window_bounds = array<i64: 8, 1>}, {pipeline_mode = #tpu.pipeline_mode<synchronous>, transform_indices = @transform_6, window_bounds = array<i64: 8, 72>}, {pipeline_mode = #tpu.pipeline_mode<synchronous>, transform_indices = @transform_7, window_bounds = array<i64: 8, 1>}, {transform_indices = @transform_8, window_bounds = array<i64: 1, 8, 16>}]} {
    %c0 = arith.constant 0 : index
    %c0_0 = arith.constant 0 : index
    %0 = vector.load %arg2[%c0, %c0_0] : memref<2x16xi32, #tpu.memory_space<vmem>>, vector<1x16xi32>
    %c1 = arith.constant 1 : index
    %c0_1 = arith.constant 0 : index
    %1 = vector.load %arg2[%c1, %c0_1] : memref<2x16xi32, #tpu.memory_space<vmem>>, vector<1x16xi32>
    %c0_2 = arith.constant 0 : index
    %c0_3 = arith.constant 0 : index
    %c0_4 = arith.constant 0 : index
    %2 = vector.load %arg1[%c0_2, %c0_3, %c0_4] : memref<1x4x256xf32, #tpu.memory_space<vmem>>, vector<1x4x256xf32>
    %3 = vector.shape_cast %2 : vector<1x4x256xf32> to vector<4x256xf32>
    %cst = arith.constant 0.000000e+00 : f32
    %4 = vector.broadcast %cst : f32 to vector<4x5xf32>
    %5 = tpu.concatenate %4, %3, %4 in 1 : vector<4x5xf32>, vector<4x256xf32>, vector<4x5xf32> -> vector<4x266xf32>
    %6 = vector.extract_strided_slice %5 {offsets = [0, 240], sizes = [4, 16], strides = [1, 1]} : vector<4x266xf32> to vector<4x16xf32>
    %c1_i32 = arith.constant 1 : i32
    %7 = vector.broadcast %c1_i32 : i32 to vector<1x16xi32>
    %8 = arith.cmpi sge, %0, %7 : vector<1x16xi32>
    %c1_i32_5 = arith.constant 1 : i32
    %9 = vector.broadcast %c1_i32_5 : i32 to vector<1x16xi32>
    %10 = arith.cmpi sge, %1, %9 : vector<1x16xi32>
    %11 = arith.andi %8, %10 : vector<1x16xi1>
    %c0_i32 = arith.constant 0 : i32
    %12 = arith.sitofp %c0_i32 : i32 to f32
    %13 = vector.shape_cast %11 : vector<1x16xi1> to vector<1x16xi1>
    %14 = vector.broadcast %13 : vector<1x16xi1> to vector<4x16xi1>
    %15 = vector.broadcast %12 : f32 to vector<4x16xf32>
    %16 = arith.select %14, %6, %15 : vector<4x16xi1>, vector<4x16xf32>
    %17 = vector.extract_strided_slice %5 {offsets = [0, 209], sizes = [4, 16], strides = [1, 1]} : vector<4x266xf32> to vector<4x16xf32>
    %c1_i32_6 = arith.constant 1 : i32
    %18 = vector.broadcast %c1_i32_6 : i32 to vector<1x16xi32>
    %19 = arith.cmpi sge, %0, %18 : vector<1x16xi32>
    %c0_i32_7 = arith.constant 0 : i32
    %20 = arith.sitofp %c0_i32_7 : i32 to f32
    %21 = vector.shape_cast %19 : vector<1x16xi1> to vector<1x16xi1>
    %22 = vector.broadcast %21 : vector<1x16xi1> to vector<4x16xi1>
    %23 = vector.broadcast %20 : f32 to vector<4x16xf32>
    %24 = arith.select %22, %17, %23 : vector<4x16xi1>, vector<4x16xf32>
    %25 = vector.extract_strided_slice %5 {offsets = [0, 116], sizes = [4, 16], strides = [1, 1]} : vector<4x266xf32> to vector<4x16xf32>
    %c1_i32_8 = arith.constant 1 : i32
    %26 = vector.broadcast %c1_i32_8 : i32 to vector<1x16xi32>
    %27 = arith.cmpi sge, %1, %26 : vector<1x16xi32>
    %c0_i32_9 = arith.constant 0 : i32
    %28 = arith.sitofp %c0_i32_9 : i32 to f32
    %29 = vector.shape_cast %27 : vector<1x16xi1> to vector<1x16xi1>
    %30 = vector.broadcast %29 : vector<1x16xi1> to vector<4x16xi1>
    %31 = vector.broadcast %28 : f32 to vector<4x16xf32>
    %32 = arith.select %30, %25, %31 : vector<4x16xi1>, vector<4x16xf32>
    %33 = vector.extract_strided_slice %5 {offsets = [0, 85], sizes = [4, 16], strides = [1, 1]} : vector<4x266xf32> to vector<4x16xf32>
    %34 = tpu.concatenate %16, %24, %32, %33 in 1 : vector<4x16xf32>, vector<4x16xf32>, vector<4x16xf32>, vector<4x16xf32> -> vector<4x64xf32>
    %35 = vector.extract_strided_slice %5 {offsets = [0, 193], sizes = [4, 16], strides = [1, 1]} : vector<4x266xf32> to vector<4x16xf32>
    %c1_i32_10 = arith.constant 1 : i32
    %36 = vector.broadcast %c1_i32_10 : i32 to vector<1x16xi32>
    %37 = arith.cmpi sge, %0, %36 : vector<1x16xi32>
    %c0_i32_11 = arith.constant 0 : i32
    %38 = arith.sitofp %c0_i32_11 : i32 to f32
    %39 = vector.shape_cast %37 : vector<1x16xi1> to vector<1x16xi1>
    %40 = vector.broadcast %39 : vector<1x16xi1> to vector<4x16xi1>
    %41 = vector.broadcast %38 : f32 to vector<4x16xf32>
    %42 = arith.select %40, %35, %41 : vector<4x16xi1>, vector<4x16xf32>
    %43 = vector.extract_strided_slice %5 {offsets = [0, 225], sizes = [4, 16], strides = [1, 1]} : vector<4x266xf32> to vector<4x16xf32>
    %c1_i32_12 = arith.constant 1 : i32
    %44 = vector.broadcast %c1_i32_12 : i32 to vector<1x16xi32>
    %45 = arith.cmpi sge, %0, %44 : vector<1x16xi32>
    %c0_i32_13 = arith.constant 0 : i32
    %46 = arith.sitofp %c0_i32_13 : i32 to f32
    %47 = vector.shape_cast %45 : vector<1x16xi1> to vector<1x16xi1>
    %48 = vector.broadcast %47 : vector<1x16xi1> to vector<4x16xi1>
    %49 = vector.broadcast %46 : f32 to vector<4x16xf32>
    %50 = arith.select %48, %43, %49 : vector<4x16xi1>, vector<4x16xf32>
    %51 = vector.extract_strided_slice %5 {offsets = [0, 69], sizes = [4, 16], strides = [1, 1]} : vector<4x266xf32> to vector<4x16xf32>
    %52 = vector.extract_strided_slice %5 {offsets = [0, 101], sizes = [4, 16], strides = [1, 1]} : vector<4x266xf32> to vector<4x16xf32>
    %53 = tpu.concatenate %42, %50, %51, %52 in 1 : vector<4x16xf32>, vector<4x16xf32>, vector<4x16xf32>, vector<4x16xf32> -> vector<4x64xf32>
    %54 = vector.extract_strided_slice %5 {offsets = [0, 209], sizes = [4, 16], strides = [1, 1]} : vector<4x266xf32> to vector<4x16xf32>
    %c1_i32_14 = arith.constant 1 : i32
    %55 = vector.broadcast %c1_i32_14 : i32 to vector<1x16xi32>
    %56 = arith.cmpi sge, %0, %55 : vector<1x16xi32>
    %c0_i32_15 = arith.constant 0 : i32
    %57 = arith.sitofp %c0_i32_15 : i32 to f32
    %58 = vector.shape_cast %56 : vector<1x16xi1> to vector<1x16xi1>
    %59 = vector.broadcast %58 : vector<1x16xi1> to vector<4x16xi1>
    %60 = vector.broadcast %57 : f32 to vector<4x16xf32>
    %61 = arith.select %59, %54, %60 : vector<4x16xi1>, vector<4x16xf32>
    %62 = vector.extract_strided_slice %5 {offsets = [0, 241], sizes = [4, 16], strides = [1, 1]} : vector<4x266xf32> to vector<4x16xf32>
    %c1_i32_16 = arith.constant 1 : i32
    %63 = vector.broadcast %c1_i32_16 : i32 to vector<1x16xi32>
    %64 = arith.cmpi sge, %0, %63 : vector<1x16xi32>
    %c0_i32_17 = arith.constant 0 : i32
    %65 = arith.sitofp %c0_i32_17 : i32 to f32
    %66 = vector.shape_cast %64 : vector<1x16xi1> to vector<1x16xi1>
    %67 = vector.broadcast %66 : vector<1x16xi1> to vector<4x16xi1>
    %68 = vector.broadcast %65 : f32 to vector<4x16xf32>
    %69 = arith.select %67, %62, %68 : vector<4x16xi1>, vector<4x16xf32>
    %70 = vector.extract_strided_slice %5 {offsets = [0, 85], sizes = [4, 16], strides = [1, 1]} : vector<4x266xf32> to vector<4x16xf32>
    %71 = vector.extract_strided_slice %5 {offsets = [0, 117], sizes = [4, 16], strides = [1, 1]} : vector<4x266xf32> to vector<4x16xf32>
    %72 = tpu.concatenate %61, %69, %70, %71 in 1 : vector<4x16xf32>, vector<4x16xf32>, vector<4x16xf32>, vector<4x16xf32> -> vector<4x64xf32>
    %73 = vector.extract_strided_slice %5 {offsets = [0, 52], sizes = [4, 16], strides = [1, 1]} : vector<4x266xf32> to vector<4x16xf32>
    %c1_i32_18 = arith.constant 1 : i32
    %74 = vector.broadcast %c1_i32_18 : i32 to vector<1x16xi32>
    %75 = arith.cmpi sge, %1, %74 : vector<1x16xi32>
    %c0_i32_19 = arith.constant 0 : i32
    %76 = arith.sitofp %c0_i32_19 : i32 to f32
    %77 = vector.shape_cast %75 : vector<1x16xi1> to vector<1x16xi1>
    %78 = vector.broadcast %77 : vector<1x16xi1> to vector<4x16xi1>
    %79 = vector.broadcast %76 : f32 to vector<4x16xf32>
    %80 = arith.select %78, %73, %79 : vector<4x16xi1>, vector<4x16xf32>
    %81 = vector.extract_strided_slice %5 {offsets = [0, 21], sizes = [4, 16], strides = [1, 1]} : vector<4x266xf32> to vector<4x16xf32>
    %82 = vector.extract_strided_slice %5 {offsets = [0, 180], sizes = [4, 16], strides = [1, 1]} : vector<4x266xf32> to vector<4x16xf32>
    %c1_i32_20 = arith.constant 1 : i32
    %83 = vector.broadcast %c1_i32_20 : i32 to vector<1x16xi32>
    %84 = arith.cmpi sge, %1, %83 : vector<1x16xi32>
    %c0_i32_21 = arith.constant 0 : i32
    %85 = arith.sitofp %c0_i32_21 : i32 to f32
    %86 = vector.shape_cast %84 : vector<1x16xi1> to vector<1x16xi1>
    %87 = vector.broadcast %86 : vector<1x16xi1> to vector<4x16xi1>
    %88 = vector.broadcast %85 : f32 to vector<4x16xf32>
    %89 = arith.select %87, %82, %88 : vector<4x16xi1>, vector<4x16xf32>
    %90 = vector.extract_strided_slice %5 {offsets = [0, 149], sizes = [4, 16], strides = [1, 1]} : vector<4x266xf32> to vector<4x16xf32>
    %91 = tpu.concatenate %80, %81, %89, %90 in 1 : vector<4x16xf32>, vector<4x16xf32>, vector<4x16xf32>, vector<4x16xf32> -> vector<4x64xf32>
    %92 = vector.extract_strided_slice %5 {offsets = [0, 5], sizes = [4, 16], strides = [1, 1]} : vector<4x266xf32> to vector<4x16xf32>
    %93 = vector.extract_strided_slice %5 {offsets = [0, 37], sizes = [4, 16], strides = [1, 1]} : vector<4x266xf32> to vector<4x16xf32>
    %94 = vector.extract_strided_slice %5 {offsets = [0, 133], sizes = [4, 16], strides = [1, 1]} : vector<4x266xf32> to vector<4x16xf32>
    %95 = vector.extract_strided_slice %5 {offsets = [0, 165], sizes = [4, 16], strides = [1, 1]} : vector<4x266xf32> to vector<4x16xf32>
    %96 = tpu.concatenate %92, %93, %94, %95 in 1 : vector<4x16xf32>, vector<4x16xf32>, vector<4x16xf32>, vector<4x16xf32> -> vector<4x64xf32>
    %97 = vector.extract_strided_slice %5 {offsets = [0, 21], sizes = [4, 16], strides = [1, 1]} : vector<4x266xf32> to vector<4x16xf32>
    %98 = vector.extract_strided_slice %5 {offsets = [0, 53], sizes = [4, 16], strides = [1, 1]} : vector<4x266xf32> to vector<4x16xf32>
    %99 = vector.extract_strided_slice %5 {offsets = [0, 149], sizes = [4, 16], strides = [1, 1]} : vector<4x266xf32> to vector<4x16xf32>
    %100 = vector.extract_strided_slice %5 {offsets = [0, 181], sizes = [4, 16], strides = [1, 1]} : vector<4x266xf32> to vector<4x16xf32>
    %101 = tpu.concatenate %97, %98, %99, %100 in 1 : vector<4x16xf32>, vector<4x16xf32>, vector<4x16xf32>, vector<4x16xf32> -> vector<4x64xf32>
    %102 = vector.extract_strided_slice %5 {offsets = [0, 116], sizes = [4, 16], strides = [1, 1]} : vector<4x266xf32> to vector<4x16xf32>
    %c1_i32_22 = arith.constant 1 : i32
    %103 = vector.broadcast %c1_i32_22 : i32 to vector<1x16xi32>
    %104 = arith.cmpi sge, %1, %103 : vector<1x16xi32>
    %c0_i32_23 = arith.constant 0 : i32
    %105 = arith.sitofp %c0_i32_23 : i32 to f32
    %106 = vector.shape_cast %104 : vector<1x16xi1> to vector<1x16xi1>
    %107 = vector.broadcast %106 : vector<1x16xi1> to vector<4x16xi1>
    %108 = vector.broadcast %105 : f32 to vector<4x16xf32>
    %109 = arith.select %107, %102, %108 : vector<4x16xi1>, vector<4x16xf32>
    %110 = vector.extract_strided_slice %5 {offsets = [0, 85], sizes = [4, 16], strides = [1, 1]} : vector<4x266xf32> to vector<4x16xf32>
    %111 = vector.extract_strided_slice %5 {offsets = [0, 244], sizes = [4, 16], strides = [1, 1]} : vector<4x266xf32> to vector<4x16xf32>
    %c1_i32_24 = arith.constant 1 : i32
    %112 = vector.broadcast %c1_i32_24 : i32 to vector<1x16xi32>
    %113 = arith.cmpi sge, %1, %112 : vector<1x16xi32>
    %c0_i32_25 = arith.constant 0 : i32
    %114 = arith.sitofp %c0_i32_25 : i32 to f32
    %115 = vector.shape_cast %113 : vector<1x16xi1> to vector<1x16xi1>
    %116 = vector.broadcast %115 : vector<1x16xi1> to vector<4x16xi1>
    %117 = vector.broadcast %114 : f32 to vector<4x16xf32>
    %118 = arith.select %116, %111, %117 : vector<4x16xi1>, vector<4x16xf32>
    %119 = vector.extract_strided_slice %5 {offsets = [0, 213], sizes = [4, 16], strides = [1, 1]} : vector<4x266xf32> to vector<4x16xf32>
    %120 = tpu.concatenate %109, %110, %118, %119 in 1 : vector<4x16xf32>, vector<4x16xf32>, vector<4x16xf32>, vector<4x16xf32> -> vector<4x64xf32>
    %121 = vector.extract_strided_slice %5 {offsets = [0, 69], sizes = [4, 16], strides = [1, 1]} : vector<4x266xf32> to vector<4x16xf32>
    %122 = vector.extract_strided_slice %5 {offsets = [0, 101], sizes = [4, 16], strides = [1, 1]} : vector<4x266xf32> to vector<4x16xf32>
    %123 = vector.extract_strided_slice %5 {offsets = [0, 197], sizes = [4, 16], strides = [1, 1]} : vector<4x266xf32> to vector<4x16xf32>
    %124 = vector.extract_strided_slice %5 {offsets = [0, 229], sizes = [4, 16], strides = [1, 1]} : vector<4x266xf32> to vector<4x16xf32>
    %125 = tpu.concatenate %121, %122, %123, %124 in 1 : vector<4x16xf32>, vector<4x16xf32>, vector<4x16xf32>, vector<4x16xf32> -> vector<4x64xf32>
    %126 = vector.extract_strided_slice %5 {offsets = [0, 85], sizes = [4, 16], strides = [1, 1]} : vector<4x266xf32> to vector<4x16xf32>
    %127 = vector.extract_strided_slice %5 {offsets = [0, 117], sizes = [4, 16], strides = [1, 1]} : vector<4x266xf32> to vector<4x16xf32>
    %128 = vector.extract_strided_slice %5 {offsets = [0, 213], sizes = [4, 16], strides = [1, 1]} : vector<4x266xf32> to vector<4x16xf32>
    %129 = vector.extract_strided_slice %5 {offsets = [0, 245], sizes = [4, 16], strides = [1, 1]} : vector<4x266xf32> to vector<4x16xf32>
    %130 = tpu.concatenate %126, %127, %128, %129 in 1 : vector<4x16xf32>, vector<4x16xf32>, vector<4x16xf32>, vector<4x16xf32> -> vector<4x64xf32>
    %131 = tpu.concatenate %34, %53, %72, %91, %96, %101, %120, %125, %130 in 0 : vector<4x64xf32>, vector<4x64xf32>, vector<4x64xf32>, vector<4x64xf32>, vector<4x64xf32>, vector<4x64xf32>, vector<4x64xf32>, vector<4x64xf32>, vector<4x64xf32> -> vector<36x64xf32>
    %c0_26 = arith.constant 0 : index
    %c0_27 = arith.constant 0 : index
    %132 = vector.load %arg3[%c0_26, %c0_27] : memref<8x36xf32, #tpu.memory_space<vmem>>, vector<8x36xf32>
    %cst_28 = arith.constant dense<0.000000e+00> : vector<8x64xf32>
    %133 = tpu.matmul %132, %131, %cst_28 {dimension_numbers = #tpu.dot_dimension_numbers<[1], [0], [0], [1], [0, 0, 1, 1], [], []>} : vector<8x36xf32>, vector<36x64xf32>, vector<8x64xf32> -> vector<8x64xf32>
    %c0_29 = arith.constant 0 : index
    %c0_30 = arith.constant 0 : index
    %134 = vector.load %arg4[%c0_29, %c0_30] : memref<8x1xf32, #tpu.memory_space<vmem>>, vector<8x1xf32>
    %135 = vector.broadcast %134 : vector<8x1xf32> to vector<8x64xf32>
    %136 = arith.addf %133, %135 : vector<8x64xf32>
    %cst_31 = arith.constant dense<0.000000e+00> : vector<8xf32>
    %137 = vector.multi_reduction <add>, %136, %cst_31 [1] : vector<8x64xf32> to vector<8xf32>
    %138 = vector.shape_cast %137 : vector<8xf32> to vector<8x1xf32>
    %cst_32 = arith.constant 6.400000e+01 : f32
    %139 = vector.broadcast %cst_32 : f32 to vector<8x1xf32>
    %140 = arith.divf %138, %139 : vector<8x1xf32>
    %141 = vector.broadcast %140 : vector<8x1xf32> to vector<8x64xf32>
    %142 = arith.subf %136, %141 : vector<8x64xf32>
    %143 = arith.mulf %142, %142 : vector<8x64xf32>
    %cst_33 = arith.constant dense<0.000000e+00> : vector<8xf32>
    %144 = vector.multi_reduction <add>, %143, %cst_33 [1] : vector<8x64xf32> to vector<8xf32>
    %145 = vector.shape_cast %144 : vector<8xf32> to vector<8x1xf32>
    %cst_34 = arith.constant 6.400000e+01 : f32
    %146 = vector.broadcast %cst_34 : f32 to vector<8x1xf32>
    %147 = arith.divf %145, %146 : vector<8x1xf32>
    %cst_35 = arith.constant 9.99999974E-6 : f32
    %148 = vector.broadcast %cst_35 : f32 to vector<8x1xf32>
    %149 = arith.addf %147, %148 : vector<8x1xf32>
    %150 = math.rsqrt %149 : vector<8x1xf32>
    %151 = vector.broadcast %150 : vector<8x1xf32> to vector<8x64xf32>
    %152 = arith.mulf %142, %151 : vector<8x64xf32>
    %cst_36 = arith.constant 2.000000e-01 : f32
    %153 = vector.broadcast %cst_36 : f32 to vector<8x64xf32>
    %154 = arith.mulf %153, %152 : vector<8x64xf32>
    %155 = arith.maximumf %152, %154 : vector<8x64xf32>
    %cst_37 = arith.constant 0.000000e+00 : f32
    %156 = vector.broadcast %cst_37 : f32 to vector<8x5xf32>
    %157 = tpu.concatenate %156, %155, %156 in 1 : vector<8x5xf32>, vector<8x64xf32>, vector<8x5xf32> -> vector<8x74xf32>
    %158 = vector.extract_strided_slice %157 {offsets = [0, 48], sizes = [8, 16], strides = [1, 1]} : vector<8x74xf32> to vector<8x16xf32>
    %c1_i32_38 = arith.constant 1 : i32
    %159 = vector.broadcast %c1_i32_38 : i32 to vector<1x16xi32>
    %160 = arith.cmpi sge, %0, %159 : vector<1x16xi32>
    %c1_i32_39 = arith.constant 1 : i32
    %161 = vector.broadcast %c1_i32_39 : i32 to vector<1x16xi32>
    %162 = arith.cmpi sge, %1, %161 : vector<1x16xi32>
    %163 = arith.andi %160, %162 : vector<1x16xi1>
    %c0_i32_40 = arith.constant 0 : i32
    %164 = arith.sitofp %c0_i32_40 : i32 to f32
    %165 = vector.shape_cast %163 : vector<1x16xi1> to vector<1x16xi1>
    %166 = vector.broadcast %165 : vector<1x16xi1> to vector<8x16xi1>
    %167 = vector.broadcast %164 : f32 to vector<8x16xf32>
    %168 = arith.select %166, %158, %167 : vector<8x16xi1>, vector<8x16xf32>
    %169 = vector.extract_strided_slice %157 {offsets = [0, 33], sizes = [8, 16], strides = [1, 1]} : vector<8x74xf32> to vector<8x16xf32>
    %c1_i32_41 = arith.constant 1 : i32
    %170 = vector.broadcast %c1_i32_41 : i32 to vector<1x16xi32>
    %171 = arith.cmpi sge, %0, %170 : vector<1x16xi32>
    %c0_i32_42 = arith.constant 0 : i32
    %172 = arith.sitofp %c0_i32_42 : i32 to f32
    %173 = vector.shape_cast %171 : vector<1x16xi1> to vector<1x16xi1>
    %174 = vector.broadcast %173 : vector<1x16xi1> to vector<8x16xi1>
    %175 = vector.broadcast %172 : f32 to vector<8x16xf32>
    %176 = arith.select %174, %169, %175 : vector<8x16xi1>, vector<8x16xf32>
    %177 = vector.extract_strided_slice %157 {offsets = [0, 20], sizes = [8, 16], strides = [1, 1]} : vector<8x74xf32> to vector<8x16xf32>
    %c1_i32_43 = arith.constant 1 : i32
    %178 = vector.broadcast %c1_i32_43 : i32 to vector<1x16xi32>
    %179 = arith.cmpi sge, %1, %178 : vector<1x16xi32>
    %c0_i32_44 = arith.constant 0 : i32
    %180 = arith.sitofp %c0_i32_44 : i32 to f32
    %181 = vector.shape_cast %179 : vector<1x16xi1> to vector<1x16xi1>
    %182 = vector.broadcast %181 : vector<1x16xi1> to vector<8x16xi1>
    %183 = vector.broadcast %180 : f32 to vector<8x16xf32>
    %184 = arith.select %182, %177, %183 : vector<8x16xi1>, vector<8x16xf32>
    %185 = vector.extract_strided_slice %157 {offsets = [0, 5], sizes = [8, 16], strides = [1, 1]} : vector<8x74xf32> to vector<8x16xf32>
    %186 = tpu.concatenate %168, %176, %184, %185 in 1 : vector<8x16xf32>, vector<8x16xf32>, vector<8x16xf32>, vector<8x16xf32> -> vector<8x64xf32>
    %187 = vector.extract_strided_slice %157 {offsets = [0, 33], sizes = [8, 16], strides = [1, 1]} : vector<8x74xf32> to vector<8x16xf32>
    %c1_i32_45 = arith.constant 1 : i32
    %188 = vector.broadcast %c1_i32_45 : i32 to vector<1x16xi32>
    %189 = arith.cmpi sge, %0, %188 : vector<1x16xi32>
    %c0_i32_46 = arith.constant 0 : i32
    %190 = arith.sitofp %c0_i32_46 : i32 to f32
    %191 = vector.shape_cast %189 : vector<1x16xi1> to vector<1x16xi1>
    %192 = vector.broadcast %191 : vector<1x16xi1> to vector<8x16xi1>
    %193 = vector.broadcast %190 : f32 to vector<8x16xf32>
    %194 = arith.select %192, %187, %193 : vector<8x16xi1>, vector<8x16xf32>
    %195 = vector.extract_strided_slice %157 {offsets = [0, 49], sizes = [8, 16], strides = [1, 1]} : vector<8x74xf32> to vector<8x16xf32>
    %c1_i32_47 = arith.constant 1 : i32
    %196 = vector.broadcast %c1_i32_47 : i32 to vector<1x16xi32>
    %197 = arith.cmpi sge, %0, %196 : vector<1x16xi32>
    %c0_i32_48 = arith.constant 0 : i32
    %198 = arith.sitofp %c0_i32_48 : i32 to f32
    %199 = vector.shape_cast %197 : vector<1x16xi1> to vector<1x16xi1>
    %200 = vector.broadcast %199 : vector<1x16xi1> to vector<8x16xi1>
    %201 = vector.broadcast %198 : f32 to vector<8x16xf32>
    %202 = arith.select %200, %195, %201 : vector<8x16xi1>, vector<8x16xf32>
    %203 = vector.extract_strided_slice %157 {offsets = [0, 5], sizes = [8, 16], strides = [1, 1]} : vector<8x74xf32> to vector<8x16xf32>
    %204 = vector.extract_strided_slice %157 {offsets = [0, 21], sizes = [8, 16], strides = [1, 1]} : vector<8x74xf32> to vector<8x16xf32>
    %205 = tpu.concatenate %194, %202, %203, %204 in 1 : vector<8x16xf32>, vector<8x16xf32>, vector<8x16xf32>, vector<8x16xf32> -> vector<8x64xf32>
    %206 = vector.extract_strided_slice %157 {offsets = [0, 49], sizes = [8, 16], strides = [1, 1]} : vector<8x74xf32> to vector<8x16xf32>
    %c1_i32_49 = arith.constant 1 : i32
    %207 = vector.broadcast %c1_i32_49 : i32 to vector<1x16xi32>
    %208 = arith.cmpi sge, %0, %207 : vector<1x16xi32>
    %c0_i32_50 = arith.constant 0 : i32
    %209 = arith.sitofp %c0_i32_50 : i32 to f32
    %210 = vector.shape_cast %208 : vector<1x16xi1> to vector<1x16xi1>
    %211 = vector.broadcast %210 : vector<1x16xi1> to vector<8x16xi1>
    %212 = vector.broadcast %209 : f32 to vector<8x16xf32>
    %213 = arith.select %211, %206, %212 : vector<8x16xi1>, vector<8x16xf32>
    %214 = vector.extract_strided_slice %157 {offsets = [0, 34], sizes = [8, 16], strides = [1, 1]} : vector<8x74xf32> to vector<8x16xf32>
    %c1_i32_51 = arith.constant 1 : i32
    %215 = vector.broadcast %c1_i32_51 : i32 to vector<1x16xi32>
    %216 = arith.cmpi sge, %0, %215 : vector<1x16xi32>
    %c2_i32 = arith.constant 2 : i32
    %217 = vector.broadcast %c2_i32 : i32 to vector<1x16xi32>
    %218 = arith.cmpi sle, %1, %217 : vector<1x16xi32>
    %219 = arith.andi %216, %218 : vector<1x16xi1>
    %c0_i32_52 = arith.constant 0 : i32
    %220 = arith.sitofp %c0_i32_52 : i32 to f32
    %221 = vector.shape_cast %219 : vector<1x16xi1> to vector<1x16xi1>
    %222 = vector.broadcast %221 : vector<1x16xi1> to vector<8x16xi1>
    %223 = vector.broadcast %220 : f32 to vector<8x16xf32>
    %224 = arith.select %222, %214, %223 : vector<8x16xi1>, vector<8x16xf32>
    %225 = vector.extract_strided_slice %157 {offsets = [0, 21], sizes = [8, 16], strides = [1, 1]} : vector<8x74xf32> to vector<8x16xf32>
    %226 = vector.extract_strided_slice %157 {offsets = [0, 6], sizes = [8, 16], strides = [1, 1]} : vector<8x74xf32> to vector<8x16xf32>
    %c2_i32_53 = arith.constant 2 : i32
    %227 = vector.broadcast %c2_i32_53 : i32 to vector<1x16xi32>
    %228 = arith.cmpi sle, %1, %227 : vector<1x16xi32>
    %c0_i32_54 = arith.constant 0 : i32
    %229 = arith.sitofp %c0_i32_54 : i32 to f32
    %230 = vector.shape_cast %228 : vector<1x16xi1> to vector<1x16xi1>
    %231 = vector.broadcast %230 : vector<1x16xi1> to vector<8x16xi1>
    %232 = vector.broadcast %229 : f32 to vector<8x16xf32>
    %233 = arith.select %231, %226, %232 : vector<8x16xi1>, vector<8x16xf32>
    %234 = tpu.concatenate %213, %224, %225, %233 in 1 : vector<8x16xf32>, vector<8x16xf32>, vector<8x16xf32>, vector<8x16xf32> -> vector<8x64xf32>
    %235 = vector.extract_strided_slice %157 {offsets = [0, 20], sizes = [8, 16], strides = [1, 1]} : vector<8x74xf32> to vector<8x16xf32>
    %c1_i32_55 = arith.constant 1 : i32
    %236 = vector.broadcast %c1_i32_55 : i32 to vector<1x16xi32>
    %237 = arith.cmpi sge, %1, %236 : vector<1x16xi32>
    %c0_i32_56 = arith.constant 0 : i32
    %238 = arith.sitofp %c0_i32_56 : i32 to f32
    %239 = vector.shape_cast %237 : vector<1x16xi1> to vector<1x16xi1>
    %240 = vector.broadcast %239 : vector<1x16xi1> to vector<8x16xi1>
    %241 = vector.broadcast %238 : f32 to vector<8x16xf32>
    %242 = arith.select %240, %235, %241 : vector<8x16xi1>, vector<8x16xf32>
    %243 = vector.extract_strided_slice %157 {offsets = [0, 5], sizes = [8, 16], strides = [1, 1]} : vector<8x74xf32> to vector<8x16xf32>
    %244 = vector.extract_strided_slice %157 {offsets = [0, 52], sizes = [8, 16], strides = [1, 1]} : vector<8x74xf32> to vector<8x16xf32>
    %c1_i32_57 = arith.constant 1 : i32
    %245 = vector.broadcast %c1_i32_57 : i32 to vector<1x16xi32>
    %246 = arith.cmpi sge, %1, %245 : vector<1x16xi32>
    %c0_i32_58 = arith.constant 0 : i32
    %247 = arith.sitofp %c0_i32_58 : i32 to f32
    %248 = vector.shape_cast %246 : vector<1x16xi1> to vector<1x16xi1>
    %249 = vector.broadcast %248 : vector<1x16xi1> to vector<8x16xi1>
    %250 = vector.broadcast %247 : f32 to vector<8x16xf32>
    %251 = arith.select %249, %244, %250 : vector<8x16xi1>, vector<8x16xf32>
    %252 = vector.extract_strided_slice %157 {offsets = [0, 37], sizes = [8, 16], strides = [1, 1]} : vector<8x74xf32> to vector<8x16xf32>
    %253 = tpu.concatenate %242, %243, %251, %252 in 1 : vector<8x16xf32>, vector<8x16xf32>, vector<8x16xf32>, vector<8x16xf32> -> vector<8x64xf32>
    %254 = vector.extract_strided_slice %157 {offsets = [0, 5], sizes = [8, 16], strides = [1, 1]} : vector<8x74xf32> to vector<8x16xf32>
    %255 = vector.extract_strided_slice %157 {offsets = [0, 21], sizes = [8, 16], strides = [1, 1]} : vector<8x74xf32> to vector<8x16xf32>
    %256 = vector.extract_strided_slice %157 {offsets = [0, 37], sizes = [8, 16], strides = [1, 1]} : vector<8x74xf32> to vector<8x16xf32>
    %257 = vector.extract_strided_slice %157 {offsets = [0, 53], sizes = [8, 16], strides = [1, 1]} : vector<8x74xf32> to vector<8x16xf32>
    %258 = tpu.concatenate %254, %255, %256, %257 in 1 : vector<8x16xf32>, vector<8x16xf32>, vector<8x16xf32>, vector<8x16xf32> -> vector<8x64xf32>
    %259 = vector.extract_strided_slice %157 {offsets = [0, 21], sizes = [8, 16], strides = [1, 1]} : vector<8x74xf32> to vector<8x16xf32>
    %260 = vector.extract_strided_slice %157 {offsets = [0, 6], sizes = [8, 16], strides = [1, 1]} : vector<8x74xf32> to vector<8x16xf32>
    %c2_i32_59 = arith.constant 2 : i32
    %261 = vector.broadcast %c2_i32_59 : i32 to vector<1x16xi32>
    %262 = arith.cmpi sle, %1, %261 : vector<1x16xi32>
    %c0_i32_60 = arith.constant 0 : i32
    %263 = arith.sitofp %c0_i32_60 : i32 to f32
    %264 = vector.shape_cast %262 : vector<1x16xi1> to vector<1x16xi1>
    %265 = vector.broadcast %264 : vector<1x16xi1> to vector<8x16xi1>
    %266 = vector.broadcast %263 : f32 to vector<8x16xf32>
    %267 = arith.select %265, %260, %266 : vector<8x16xi1>, vector<8x16xf32>
    %268 = vector.extract_strided_slice %157 {offsets = [0, 53], sizes = [8, 16], strides = [1, 1]} : vector<8x74xf32> to vector<8x16xf32>
    %269 = vector.extract_strided_slice %157 {offsets = [0, 38], sizes = [8, 16], strides = [1, 1]} : vector<8x74xf32> to vector<8x16xf32>
    %c2_i32_61 = arith.constant 2 : i32
    %270 = vector.broadcast %c2_i32_61 : i32 to vector<1x16xi32>
    %271 = arith.cmpi sle, %1, %270 : vector<1x16xi32>
    %c0_i32_62 = arith.constant 0 : i32
    %272 = arith.sitofp %c0_i32_62 : i32 to f32
    %273 = vector.shape_cast %271 : vector<1x16xi1> to vector<1x16xi1>
    %274 = vector.broadcast %273 : vector<1x16xi1> to vector<8x16xi1>
    %275 = vector.broadcast %272 : f32 to vector<8x16xf32>
    %276 = arith.select %274, %269, %275 : vector<8x16xi1>, vector<8x16xf32>
    %277 = tpu.concatenate %259, %267, %268, %276 in 1 : vector<8x16xf32>, vector<8x16xf32>, vector<8x16xf32>, vector<8x16xf32> -> vector<8x64xf32>
    %278 = vector.extract_strided_slice %157 {offsets = [0, 52], sizes = [8, 16], strides = [1, 1]} : vector<8x74xf32> to vector<8x16xf32>
    %c1_i32_63 = arith.constant 1 : i32
    %279 = vector.broadcast %c1_i32_63 : i32 to vector<1x16xi32>
    %280 = arith.cmpi sge, %1, %279 : vector<1x16xi32>
    %c0_i32_64 = arith.constant 0 : i32
    %281 = arith.sitofp %c0_i32_64 : i32 to f32
    %282 = vector.shape_cast %280 : vector<1x16xi1> to vector<1x16xi1>
    %283 = vector.broadcast %282 : vector<1x16xi1> to vector<8x16xi1>
    %284 = vector.broadcast %281 : f32 to vector<8x16xf32>
    %285 = arith.select %283, %278, %284 : vector<8x16xi1>, vector<8x16xf32>
    %286 = vector.extract_strided_slice %157 {offsets = [0, 37], sizes = [8, 16], strides = [1, 1]} : vector<8x74xf32> to vector<8x16xf32>
    %287 = vector.extract_strided_slice %157 {offsets = [0, 24], sizes = [8, 16], strides = [1, 1]} : vector<8x74xf32> to vector<8x16xf32>
    %c2_i32_65 = arith.constant 2 : i32
    %288 = vector.broadcast %c2_i32_65 : i32 to vector<1x16xi32>
    %289 = arith.cmpi sle, %0, %288 : vector<1x16xi32>
    %c1_i32_66 = arith.constant 1 : i32
    %290 = vector.broadcast %c1_i32_66 : i32 to vector<1x16xi32>
    %291 = arith.cmpi sge, %1, %290 : vector<1x16xi32>
    %292 = arith.andi %289, %291 : vector<1x16xi1>
    %c0_i32_67 = arith.constant 0 : i32
    %293 = arith.sitofp %c0_i32_67 : i32 to f32
    %294 = vector.shape_cast %292 : vector<1x16xi1> to vector<1x16xi1>
    %295 = vector.broadcast %294 : vector<1x16xi1> to vector<8x16xi1>
    %296 = vector.broadcast %293 : f32 to vector<8x16xf32>
    %297 = arith.select %295, %287, %296 : vector<8x16xi1>, vector<8x16xf32>
    %298 = vector.extract_strided_slice %157 {offsets = [0, 9], sizes = [8, 16], strides = [1, 1]} : vector<8x74xf32> to vector<8x16xf32>
    %c2_i32_68 = arith.constant 2 : i32
    %299 = vector.broadcast %c2_i32_68 : i32 to vector<1x16xi32>
    %300 = arith.cmpi sle, %0, %299 : vector<1x16xi32>
    %c0_i32_69 = arith.constant 0 : i32
    %301 = arith.sitofp %c0_i32_69 : i32 to f32
    %302 = vector.shape_cast %300 : vector<1x16xi1> to vector<1x16xi1>
    %303 = vector.broadcast %302 : vector<1x16xi1> to vector<8x16xi1>
    %304 = vector.broadcast %301 : f32 to vector<8x16xf32>
    %305 = arith.select %303, %298, %304 : vector<8x16xi1>, vector<8x16xf32>
    %306 = tpu.concatenate %285, %286, %297, %305 in 1 : vector<8x16xf32>, vector<8x16xf32>, vector<8x16xf32>, vector<8x16xf32> -> vector<8x64xf32>
    %307 = vector.extract_strided_slice %157 {offsets = [0, 37], sizes = [8, 16], strides = [1, 1]} : vector<8x74xf32> to vector<8x16xf32>
    %308 = vector.extract_strided_slice %157 {offsets = [0, 53], sizes = [8, 16], strides = [1, 1]} : vector<8x74xf32> to vector<8x16xf32>
    %309 = vector.extract_strided_slice %157 {offsets = [0, 9], sizes = [8, 16], strides = [1, 1]} : vector<8x74xf32> to vector<8x16xf32>
    %c2_i32_70 = arith.constant 2 : i32
    %310 = vector.broadcast %c2_i32_70 : i32 to vector<1x16xi32>
    %311 = arith.cmpi sle, %0, %310 : vector<1x16xi32>
    %c0_i32_71 = arith.constant 0 : i32
    %312 = arith.sitofp %c0_i32_71 : i32 to f32
    %313 = vector.shape_cast %311 : vector<1x16xi1> to vector<1x16xi1>
    %314 = vector.broadcast %313 : vector<1x16xi1> to vector<8x16xi1>
    %315 = vector.broadcast %312 : f32 to vector<8x16xf32>
    %316 = arith.select %314, %309, %315 : vector<8x16xi1>, vector<8x16xf32>
    %317 = vector.extract_strided_slice %157 {offsets = [0, 25], sizes = [8, 16], strides = [1, 1]} : vector<8x74xf32> to vector<8x16xf32>
    %c2_i32_72 = arith.constant 2 : i32
    %318 = vector.broadcast %c2_i32_72 : i32 to vector<1x16xi32>
    %319 = arith.cmpi sle, %0, %318 : vector<1x16xi32>
    %c0_i32_73 = arith.constant 0 : i32
    %320 = arith.sitofp %c0_i32_73 : i32 to f32
    %321 = vector.shape_cast %319 : vector<1x16xi1> to vector<1x16xi1>
    %322 = vector.broadcast %321 : vector<1x16xi1> to vector<8x16xi1>
    %323 = vector.broadcast %320 : f32 to vector<8x16xf32>
    %324 = arith.select %322, %317, %323 : vector<8x16xi1>, vector<8x16xf32>
    %325 = tpu.concatenate %307, %308, %316, %324 in 1 : vector<8x16xf32>, vector<8x16xf32>, vector<8x16xf32>, vector<8x16xf32> -> vector<8x64xf32>
    %326 = vector.extract_strided_slice %157 {offsets = [0, 53], sizes = [8, 16], strides = [1, 1]} : vector<8x74xf32> to vector<8x16xf32>
    %327 = vector.extract_strided_slice %157 {offsets = [0, 38], sizes = [8, 16], strides = [1, 1]} : vector<8x74xf32> to vector<8x16xf32>
    %c2_i32_74 = arith.constant 2 : i32
    %328 = vector.broadcast %c2_i32_74 : i32 to vector<1x16xi32>
    %329 = arith.cmpi sle, %1, %328 : vector<1x16xi32>
    %c0_i32_75 = arith.constant 0 : i32
    %330 = arith.sitofp %c0_i32_75 : i32 to f32
    %331 = vector.shape_cast %329 : vector<1x16xi1> to vector<1x16xi1>
    %332 = vector.broadcast %331 : vector<1x16xi1> to vector<8x16xi1>
    %333 = vector.broadcast %330 : f32 to vector<8x16xf32>
    %334 = arith.select %332, %327, %333 : vector<8x16xi1>, vector<8x16xf32>
    %335 = vector.extract_strided_slice %157 {offsets = [0, 25], sizes = [8, 16], strides = [1, 1]} : vector<8x74xf32> to vector<8x16xf32>
    %c2_i32_76 = arith.constant 2 : i32
    %336 = vector.broadcast %c2_i32_76 : i32 to vector<1x16xi32>
    %337 = arith.cmpi sle, %0, %336 : vector<1x16xi32>
    %c0_i32_77 = arith.constant 0 : i32
    %338 = arith.sitofp %c0_i32_77 : i32 to f32
    %339 = vector.shape_cast %337 : vector<1x16xi1> to vector<1x16xi1>
    %340 = vector.broadcast %339 : vector<1x16xi1> to vector<8x16xi1>
    %341 = vector.broadcast %338 : f32 to vector<8x16xf32>
    %342 = arith.select %340, %335, %341 : vector<8x16xi1>, vector<8x16xf32>
    %343 = vector.extract_strided_slice %157 {offsets = [0, 10], sizes = [8, 16], strides = [1, 1]} : vector<8x74xf32> to vector<8x16xf32>
    %c2_i32_78 = arith.constant 2 : i32
    %344 = vector.broadcast %c2_i32_78 : i32 to vector<1x16xi32>
    %345 = arith.cmpi sle, %0, %344 : vector<1x16xi32>
    %c2_i32_79 = arith.constant 2 : i32
    %346 = vector.broadcast %c2_i32_79 : i32 to vector<1x16xi32>
    %347 = arith.cmpi sle, %1, %346 : vector<1x16xi32>
    %348 = arith.andi %345, %347 : vector<1x16xi1>
    %c0_i32_80 = arith.constant 0 : i32
    %349 = arith.sitofp %c0_i32_80 : i32 to f32
    %350 = vector.shape_cast %348 : vector<1x16xi1> to vector<1x16xi1>
    %351 = vector.broadcast %350 : vector<1x16xi1> to vector<8x16xi1>
    %352 = vector.broadcast %349 : f32 to vector<8x16xf32>
    %353 = arith.select %351, %343, %352 : vector<8x16xi1>, vector<8x16xf32>
    %354 = tpu.concatenate %326, %334, %342, %353 in 1 : vector<8x16xf32>, vector<8x16xf32>, vector<8x16xf32>, vector<8x16xf32> -> vector<8x64xf32>
    %355 = tpu.concatenate %186, %205, %234, %253, %258, %277, %306, %325, %354 in 0 : vector<8x64xf32>, vector<8x64xf32>, vector<8x64xf32>, vector<8x64xf32>, vector<8x64xf32>, vector<8x64xf32>, vector<8x64xf32>, vector<8x64xf32>, vector<8x64xf32> -> vector<72x64xf32>
    %c0_81 = arith.constant 0 : index
    %c0_82 = arith.constant 0 : index
    %356 = vector.load %arg5[%c0_81, %c0_82] : memref<8x72xf32, #tpu.memory_space<vmem>>, vector<8x72xf32>
    %cst_83 = arith.constant dense<0.000000e+00> : vector<8x64xf32>
    %357 = tpu.matmul %356, %355, %cst_83 {dimension_numbers = #tpu.dot_dimension_numbers<[1], [0], [0], [1], [0, 0, 1, 1], [], []>} : vector<8x72xf32>, vector<72x64xf32>, vector<8x64xf32> -> vector<8x64xf32>
    %c0_84 = arith.constant 0 : index
    %c0_85 = arith.constant 0 : index
    %358 = vector.load %arg6[%c0_84, %c0_85] : memref<8x1xf32, #tpu.memory_space<vmem>>, vector<8x1xf32>
    %359 = vector.broadcast %358 : vector<8x1xf32> to vector<8x64xf32>
    %360 = arith.addf %357, %359 : vector<8x64xf32>
    %cst_86 = arith.constant dense<0.000000e+00> : vector<8xf32>
    %361 = vector.multi_reduction <add>, %360, %cst_86 [1] : vector<8x64xf32> to vector<8xf32>
    %362 = vector.shape_cast %361 : vector<8xf32> to vector<8x1xf32>
    %cst_87 = arith.constant 6.400000e+01 : f32
    %363 = vector.broadcast %cst_87 : f32 to vector<8x1xf32>
    %364 = arith.divf %362, %363 : vector<8x1xf32>
    %365 = vector.broadcast %364 : vector<8x1xf32> to vector<8x64xf32>
    %366 = arith.subf %360, %365 : vector<8x64xf32>
    %367 = arith.mulf %366, %366 : vector<8x64xf32>
    %cst_88 = arith.constant dense<0.000000e+00> : vector<8xf32>
    %368 = vector.multi_reduction <add>, %367, %cst_88 [1] : vector<8x64xf32> to vector<8xf32>
    %369 = vector.shape_cast %368 : vector<8xf32> to vector<8x1xf32>
    %cst_89 = arith.constant 6.400000e+01 : f32
    %370 = vector.broadcast %cst_89 : f32 to vector<8x1xf32>
    %371 = arith.divf %369, %370 : vector<8x1xf32>
    %cst_90 = arith.constant 9.99999974E-6 : f32
    %372 = vector.broadcast %cst_90 : f32 to vector<8x1xf32>
    %373 = arith.addf %371, %372 : vector<8x1xf32>
    %374 = math.rsqrt %373 : vector<8x1xf32>
    %375 = vector.broadcast %374 : vector<8x1xf32> to vector<8x64xf32>
    %376 = arith.mulf %366, %375 : vector<8x64xf32>
    %cst_91 = arith.constant 2.000000e-01 : f32
    %377 = vector.broadcast %cst_91 : f32 to vector<8x64xf32>
    %378 = arith.mulf %377, %376 : vector<8x64xf32>
    %379 = arith.maximumf %376, %378 : vector<8x64xf32>
    %380 = vector.extract_strided_slice %379 {offsets = [0, 0], sizes = [8, 16], strides = [1, 1]} : vector<8x64xf32> to vector<8x16xf32>
    %381 = vector.extract_strided_slice %379 {offsets = [0, 16], sizes = [8, 16], strides = [1, 1]} : vector<8x64xf32> to vector<8x16xf32>
    %382 = arith.maximumf %380, %381 : vector<8x16xf32>
    %383 = vector.extract_strided_slice %379 {offsets = [0, 32], sizes = [8, 16], strides = [1, 1]} : vector<8x64xf32> to vector<8x16xf32>
    %384 = arith.maximumf %382, %383 : vector<8x16xf32>
    %385 = vector.extract_strided_slice %379 {offsets = [0, 48], sizes = [8, 16], strides = [1, 1]} : vector<8x64xf32> to vector<8x16xf32>
    %386 = arith.maximumf %384, %385 : vector<8x16xf32>
    %cst_92 = arith.constant 0.000000e+00 : f32
    %387 = vector.broadcast %cst_92 : f32 to vector<8x5xf32>
    %388 = tpu.concatenate %387, %386, %387 in 1 : vector<8x5xf32>, vector<8x16xf32>, vector<8x5xf32> -> vector<8x26xf32>
    %389 = vector.extract_strided_slice %388 {offsets = [0, 0], sizes = [8, 16], strides = [1, 1]} : vector<8x26xf32> to vector<8x16xf32>
    %c1_i32_93 = arith.constant 1 : i32
    %390 = vector.broadcast %c1_i32_93 : i32 to vector<1x16xi32>
    %391 = arith.cmpi sge, %0, %390 : vector<1x16xi32>
    %c1_i32_94 = arith.constant 1 : i32
    %392 = vector.broadcast %c1_i32_94 : i32 to vector<1x16xi32>
    %393 = arith.cmpi sge, %1, %392 : vector<1x16xi32>
    %394 = arith.andi %391, %393 : vector<1x16xi1>
    %c0_i32_95 = arith.constant 0 : i32
    %395 = arith.sitofp %c0_i32_95 : i32 to f32
    %396 = vector.shape_cast %394 : vector<1x16xi1> to vector<1x16xi1>
    %397 = vector.broadcast %396 : vector<1x16xi1> to vector<8x16xi1>
    %398 = vector.broadcast %395 : f32 to vector<8x16xf32>
    %399 = arith.select %397, %389, %398 : vector<8x16xi1>, vector<8x16xf32>
    %400 = vector.extract_strided_slice %388 {offsets = [0, 1], sizes = [8, 16], strides = [1, 1]} : vector<8x26xf32> to vector<8x16xf32>
    %c1_i32_96 = arith.constant 1 : i32
    %401 = vector.broadcast %c1_i32_96 : i32 to vector<1x16xi32>
    %402 = arith.cmpi sge, %0, %401 : vector<1x16xi32>
    %c0_i32_97 = arith.constant 0 : i32
    %403 = arith.sitofp %c0_i32_97 : i32 to f32
    %404 = vector.shape_cast %402 : vector<1x16xi1> to vector<1x16xi1>
    %405 = vector.broadcast %404 : vector<1x16xi1> to vector<8x16xi1>
    %406 = vector.broadcast %403 : f32 to vector<8x16xf32>
    %407 = arith.select %405, %400, %406 : vector<8x16xi1>, vector<8x16xf32>
    %408 = vector.extract_strided_slice %388 {offsets = [0, 2], sizes = [8, 16], strides = [1, 1]} : vector<8x26xf32> to vector<8x16xf32>
    %c1_i32_98 = arith.constant 1 : i32
    %409 = vector.broadcast %c1_i32_98 : i32 to vector<1x16xi32>
    %410 = arith.cmpi sge, %0, %409 : vector<1x16xi32>
    %c2_i32_99 = arith.constant 2 : i32
    %411 = vector.broadcast %c2_i32_99 : i32 to vector<1x16xi32>
    %412 = arith.cmpi sle, %1, %411 : vector<1x16xi32>
    %413 = arith.andi %410, %412 : vector<1x16xi1>
    %c0_i32_100 = arith.constant 0 : i32
    %414 = arith.sitofp %c0_i32_100 : i32 to f32
    %415 = vector.shape_cast %413 : vector<1x16xi1> to vector<1x16xi1>
    %416 = vector.broadcast %415 : vector<1x16xi1> to vector<8x16xi1>
    %417 = vector.broadcast %414 : f32 to vector<8x16xf32>
    %418 = arith.select %416, %408, %417 : vector<8x16xi1>, vector<8x16xf32>
    %419 = vector.extract_strided_slice %388 {offsets = [0, 4], sizes = [8, 16], strides = [1, 1]} : vector<8x26xf32> to vector<8x16xf32>
    %c1_i32_101 = arith.constant 1 : i32
    %420 = vector.broadcast %c1_i32_101 : i32 to vector<1x16xi32>
    %421 = arith.cmpi sge, %1, %420 : vector<1x16xi32>
    %c0_i32_102 = arith.constant 0 : i32
    %422 = arith.sitofp %c0_i32_102 : i32 to f32
    %423 = vector.shape_cast %421 : vector<1x16xi1> to vector<1x16xi1>
    %424 = vector.broadcast %423 : vector<1x16xi1> to vector<8x16xi1>
    %425 = vector.broadcast %422 : f32 to vector<8x16xf32>
    %426 = arith.select %424, %419, %425 : vector<8x16xi1>, vector<8x16xf32>
    %427 = vector.extract_strided_slice %388 {offsets = [0, 5], sizes = [8, 16], strides = [1, 1]} : vector<8x26xf32> to vector<8x16xf32>
    %428 = vector.extract_strided_slice %388 {offsets = [0, 6], sizes = [8, 16], strides = [1, 1]} : vector<8x26xf32> to vector<8x16xf32>
    %c2_i32_103 = arith.constant 2 : i32
    %429 = vector.broadcast %c2_i32_103 : i32 to vector<1x16xi32>
    %430 = arith.cmpi sle, %1, %429 : vector<1x16xi32>
    %c0_i32_104 = arith.constant 0 : i32
    %431 = arith.sitofp %c0_i32_104 : i32 to f32
    %432 = vector.shape_cast %430 : vector<1x16xi1> to vector<1x16xi1>
    %433 = vector.broadcast %432 : vector<1x16xi1> to vector<8x16xi1>
    %434 = vector.broadcast %431 : f32 to vector<8x16xf32>
    %435 = arith.select %433, %428, %434 : vector<8x16xi1>, vector<8x16xf32>
    %436 = vector.extract_strided_slice %388 {offsets = [0, 8], sizes = [8, 16], strides = [1, 1]} : vector<8x26xf32> to vector<8x16xf32>
    %c2_i32_105 = arith.constant 2 : i32
    %437 = vector.broadcast %c2_i32_105 : i32 to vector<1x16xi32>
    %438 = arith.cmpi sle, %0, %437 : vector<1x16xi32>
    %c1_i32_106 = arith.constant 1 : i32
    %439 = vector.broadcast %c1_i32_106 : i32 to vector<1x16xi32>
    %440 = arith.cmpi sge, %1, %439 : vector<1x16xi32>
    %441 = arith.andi %438, %440 : vector<1x16xi1>
    %c0_i32_107 = arith.constant 0 : i32
    %442 = arith.sitofp %c0_i32_107 : i32 to f32
    %443 = vector.shape_cast %441 : vector<1x16xi1> to vector<1x16xi1>
    %444 = vector.broadcast %443 : vector<1x16xi1> to vector<8x16xi1>
    %445 = vector.broadcast %442 : f32 to vector<8x16xf32>
    %446 = arith.select %444, %436, %445 : vector<8x16xi1>, vector<8x16xf32>
    %447 = vector.extract_strided_slice %388 {offsets = [0, 9], sizes = [8, 16], strides = [1, 1]} : vector<8x26xf32> to vector<8x16xf32>
    %c2_i32_108 = arith.constant 2 : i32
    %448 = vector.broadcast %c2_i32_108 : i32 to vector<1x16xi32>
    %449 = arith.cmpi sle, %0, %448 : vector<1x16xi32>
    %c0_i32_109 = arith.constant 0 : i32
    %450 = arith.sitofp %c0_i32_109 : i32 to f32
    %451 = vector.shape_cast %449 : vector<1x16xi1> to vector<1x16xi1>
    %452 = vector.broadcast %451 : vector<1x16xi1> to vector<8x16xi1>
    %453 = vector.broadcast %450 : f32 to vector<8x16xf32>
    %454 = arith.select %452, %447, %453 : vector<8x16xi1>, vector<8x16xf32>
    %455 = vector.extract_strided_slice %388 {offsets = [0, 10], sizes = [8, 16], strides = [1, 1]} : vector<8x26xf32> to vector<8x16xf32>
    %c2_i32_110 = arith.constant 2 : i32
    %456 = vector.broadcast %c2_i32_110 : i32 to vector<1x16xi32>
    %457 = arith.cmpi sle, %0, %456 : vector<1x16xi32>
    %c2_i32_111 = arith.constant 2 : i32
    %458 = vector.broadcast %c2_i32_111 : i32 to vector<1x16xi32>
    %459 = arith.cmpi sle, %1, %458 : vector<1x16xi32>
    %460 = arith.andi %457, %459 : vector<1x16xi1>
    %c0_i32_112 = arith.constant 0 : i32
    %461 = arith.sitofp %c0_i32_112 : i32 to f32
    %462 = vector.shape_cast %460 : vector<1x16xi1> to vector<1x16xi1>
    %463 = vector.broadcast %462 : vector<1x16xi1> to vector<8x16xi1>
    %464 = vector.broadcast %461 : f32 to vector<8x16xf32>
    %465 = arith.select %463, %455, %464 : vector<8x16xi1>, vector<8x16xf32>
    %466 = tpu.concatenate %399, %407, %418, %426, %427, %435, %446, %454, %465 in 0 : vector<8x16xf32>, vector<8x16xf32>, vector<8x16xf32>, vector<8x16xf32>, vector<8x16xf32>, vector<8x16xf32>, vector<8x16xf32>, vector<8x16xf32>, vector<8x16xf32> -> vector<72x16xf32>
    %c0_113 = arith.constant 0 : index
    %c0_114 = arith.constant 0 : index
    %467 = vector.load %arg7[%c0_113, %c0_114] : memref<8x72xf32, #tpu.memory_space<vmem>>, vector<8x72xf32>
    %cst_115 = arith.constant dense<0.000000e+00> : vector<8x16xf32>
    %468 = tpu.matmul %467, %466, %cst_115 {dimension_numbers = #tpu.dot_dimension_numbers<[1], [0], [0], [1], [0, 0, 1, 1], [], []>} : vector<8x72xf32>, vector<72x16xf32>, vector<8x16xf32> -> vector<8x16xf32>
    %c0_116 = arith.constant 0 : index
    %c0_117 = arith.constant 0 : index
    %469 = vector.load %arg8[%c0_116, %c0_117] : memref<8x1xf32, #tpu.memory_space<vmem>>, vector<8x1xf32>
    %470 = vector.broadcast %469 : vector<8x1xf32> to vector<8x16xf32>
    %471 = arith.addf %468, %470 : vector<8x16xf32>
    %472 = tpu.iota {dimensions = array<i32: 0>} : vector<8x16xi32>
    %cst_118 = arith.constant 0.000000e+00 : f32
    %473 = vector.broadcast %cst_118 : f32 to vector<8x16xf32>
    %474 = arith.maximumf %471, %473 : vector<8x16xf32>
    %475 = math.absf %471 : vector<8x16xf32>
    %cst_119 = arith.constant 0.000000e+00 : f32
    %476 = vector.broadcast %cst_119 : f32 to vector<8x16xf32>
    %477 = arith.subf %476, %475 : vector<8x16xf32>
    %478 = math.exp %477 : vector<8x16xf32>
    %cst_120 = arith.constant 1.000000e+00 : f32
    %479 = vector.broadcast %cst_120 : f32 to vector<8x16xf32>
    %480 = arith.addf %479, %478 : vector<8x16xf32>
    %481 = math.log %480 : vector<8x16xf32>
    %482 = arith.addf %474, %481 : vector<8x16xf32>
    %c4_i32 = arith.constant 4 : i32
    %483 = vector.broadcast %c4_i32 : i32 to vector<8x16xi32>
    %484 = arith.cmpi slt, %472, %483 : vector<8x16xi32>
    %485 = arith.select %484, %471, %482 : vector<8x16xi1>, vector<8x16xf32>
    %c0_121 = arith.constant 0 : index
    %c0_122 = arith.constant 0 : index
    %c0_123 = arith.constant 0 : index
    %486 = vector.load %arg9[%c0_121, %c0_122, %c0_123] : memref<1x8x16xf32, #tpu.memory_space<vmem>>, vector<1x8x16xf32>
    %487 = vector.shape_cast %486 : vector<1x8x16xf32> to vector<8x16xf32>
    %488 = vector.shape_cast %485 : vector<8x16xf32> to vector<1x8x16xf32>
    tpu.vector_store %arg9[%c0_121, %c0_122, %c0_123], %488 {strides = array<i32>} : memref<1x8x16xf32, #tpu.memory_space<vmem>>, vector<1x8x16xf32>,
    return
  }
  func.func @transform_0(%arg0: i32) -> (i32, i32, i32) {
    %c0_i32 = arith.constant 0 : i32
    %c0_i32_0 = arith.constant 0 : i32
    %c0_i32_1 = arith.constant 0 : i32
    return %arg0, %c0_i32, %c0_i32_0 : i32, i32, i32
  }
  func.func @transform_1(%arg0: i32) -> (i32, i32) {
    %c0_i32 = arith.constant 0 : i32
    %c0_i32_0 = arith.constant 0 : i32
    %c0_i32_1 = arith.constant 0 : i32
    return %c0_i32, %c0_i32_0 : i32, i32
  }
  func.func @transform_2(%arg0: i32) -> (i32, i32) {
    %c0_i32 = arith.constant 0 : i32
    %c0_i32_0 = arith.constant 0 : i32
    %c0_i32_1 = arith.constant 0 : i32
    return %c0_i32, %c0_i32_0 : i32, i32
  }
  func.func @transform_3(%arg0: i32) -> (i32, i32) {
    %c0_i32 = arith.constant 0 : i32
    %c0_i32_0 = arith.constant 0 : i32
    %c0_i32_1 = arith.constant 0 : i32
    return %c0_i32, %c0_i32_0 : i32, i32
  }
  func.func @transform_4(%arg0: i32) -> (i32, i32) {
    %c0_i32 = arith.constant 0 : i32
    %c0_i32_0 = arith.constant 0 : i32
    %c0_i32_1 = arith.constant 0 : i32
    return %c0_i32, %c0_i32_0 : i32, i32
  }
  func.func @transform_5(%arg0: i32) -> (i32, i32) {
    %c0_i32 = arith.constant 0 : i32
    %c0_i32_0 = arith.constant 0 : i32
    %c0_i32_1 = arith.constant 0 : i32
    return %c0_i32, %c0_i32_0 : i32, i32
  }
  func.func @transform_6(%arg0: i32) -> (i32, i32) {
    %c0_i32 = arith.constant 0 : i32
    %c0_i32_0 = arith.constant 0 : i32
    %c0_i32_1 = arith.constant 0 : i32
    return %c0_i32, %c0_i32_0 : i32, i32
  }
  func.func @transform_7(%arg0: i32) -> (i32, i32) {
    %c0_i32 = arith.constant 0 : i32
    %c0_i32_0 = arith.constant 0 : i32
    %c0_i32_1 = arith.constant 0 : i32
    return %c0_i32, %c0_i32_0 : i32, i32
  }
  func.func @transform_8(%arg0: i32) -> (i32, i32, i32) {
    %c0_i32 = arith.constant 0 : i32
    %c0_i32_0 = arith.constant 0 : i32
    %c0_i32_1 = arith.constant 0 : i32
    return %arg0, %c0_i32, %c0_i32_0 : i32, i32, i32
  }
}

</mosaic_0001>

<bundles_post_ra>
// kernel: simple_param_net_forward.1
= control target key start
LH: loop header
LB: loop body
LE: loop exit
PB: predicated region body
PF: predicated region fallthrough
CT: control target
= control target key end

     0   :  { %s1347_s27 = smov 0   ;;  %s1725_s0 = inlined_call_operand.vmem [shape: f32[2,4,256], index: 0, kind: input, shape index: {}]   ;;  %s1726_s1 = inlined_call_operand.vmem [shape: s32[2,16], index: 1, kind: input, shape index: {}]   ;;  %s1727_s2 = inlined_call_operand.vmem [shape: f32[8,36], index: 2, kind: input, shape index: {}]   ;;  %s1728_s3 = inlined_call_operand.vmem [shape: f32[8,1], index: 3, kind: input, shape index: {}]   ;;  %s1729_s4 = inlined_call_operand.vmem [shape: f32[8,72], index: 4, kind: input, shape index: {}]   ;;  %s1730_s5 = inlined_call_operand.vmem [shape: f32[8,1], index: 5, kind: input, shape index: {}]   ;;  %s1731_s6 = inlined_call_operand.vmem [shape: f32[8,72], index: 6, kind: input, shape index: {}]   ;;  %s1732_s7 = inlined_call_operand.vmem [shape: f32[8,1], index: 7, kind: input, shape index: {}]   ;;  %s1733_s8 = inlined_call_operand.vmem [shape: f32[2,8,16], index: 8, kind: output, shape index: {}]  }
   0x1 LB: > { %s1095_s28 = sadd.s32 4294967295, %s1262_s27   ;;  %p1099_p0 = scmp.ge.s32.totalorder %s1262_s27, 1  ;;  %s1262_s27 = sphi %s1347_s27, %s18_s27  }
   0x2   : > { %p262_p1 = scmp.lt.s32.totalorder %s1262_s27, 3 }
   0x4   : > { %p263_p2 = pnand %p1099_p0, %p262_p1 }
   0x5   : > { %p295_p3 = scmp.lt.s32.totalorder (!%p263_p2), %s1095_s28, 1  ;;  %s1264_s11 = smov (!%p263_p2), 5  }
   0x6   : > { %266 = sbr.rel (%p263_p2) target bundleno = 2387 (0x953), region = 52  ;;  %s1266_s12 = smov (!%p263_p2), 15  }
   0x7   : > { %s1267_s13 = smov (!%p263_p2), 12   ;;  %s1268_s14 = smov (!%p263_p2), 76  }
   0x8   : > { %s1269_s15 = smov (!%p263_p2), 47   ;;  %s1270_s16 = smov (!%p263_p2), 59  }
   0x9   : > { %s1271_s17 = smov (!%p263_p2), 31   ;;  %s1272_s18 = smov (!%p263_p2), 43  }
   0xa   : > { %s1273_s19 = smov (!%p263_p2), 27   ;;  %s1274_s20 = smov (!%p263_p2), 75  }
   0xb   : > { %s1751_s28 = smov (!%p295_p3, %s1095_s28), 1  ;;  %v1265_v2 = vmov 0   ;;  %vm313_vm0 = vcmask 39936   ;;  %s1275_s21 = smov 91   ;;  %v1277_v8 = vmov 0.0   ;;  %v323_v9 = vlaneseq  ;;  %v506_v41 = vld [vmem:[%s1728_s3] sm:$0xff] }
   0xc   : > { %s1117_s29 = sshll.u32 %s1751_s28, 3  ;;  %1245 = vset.pattern.permute.xlu1 %v1265_v2  ;;  %1246 = vset.pattern.permute.xlu0 %v1265_v2  ;;  %s1276_s22 = smov 107   ;;  %v1389_v10 = vld [vmem:[%s1726_s1 + $0x1] sm:$0x1]  ;;  %v1403_v14 = vld [vmem:[%s1726_s1] sm:$0x1] }
   0xd   : > { %s299_s10 = scalar_lea.vmem %s1725_s0, %s1117_s29  ;;  %1144 = vmatprep.subr.mxu0 %v1277_v8  ;;  %1157 = vmatprep.subr.mxu1 %v1277_v8  ;;  %s1278_s23 = smov 123   ;;  %v1391_v11 = vshrl.u32 %v323_v9, 7  ;;  %vm320_vm1 = vcmp.ge.s32.totalorder %v1389_v10, 1  ;;  %vm319_vm2 = vcmp.ge.s32.totalorder %v1403_v14, 1  ;;  %vm353_vm4 = vcmask 97280  }
   0xe   : > { %v306_v0 = vld [vmem:[%s299_s10] sm:$0xff]  ;;  %s1279_s24 = smov 11   ;;  %s1280_s25 = smov 63   ;;  %v342_v13 = vsel %vm320_vm1, 1, %v1265_v2  ;;  %v332_v19 = vsel %vm319_vm2, 1, %v1265_v2  ;;  %vm397_vm5 = vcmask 121856   ;;  %vm321_vm14 = vmand %vm319_vm2, %vm320_vm1 }
   0xf   : > { %309 = vrot.lane.b32.xlu0 %v306_v0, %s1264_s11  ;;  %v308_v1 = vcombine.high %v306_v0, %v306_v0  ;;  %s1281_s26 = smov 16   ;;  %v1395_v12 = vsub.s32 0, %v1391_v11  ;;  %vm1283_vm6 = vmmov 0   ;;  %vm368_vm8 = vcmask 130048   ;;  %s1284_s30 = smov 103  }
  0x10   : > { %1154 = vmatprep.mubr.msk.f32.mxu0 %vm1283_vm6, %v1277_v8  ;;  %1175 = vmatprep.mubr.msk.f32.mxu1 %vm1283_vm6, %v1277_v8  ;;  %vm409_vm9 = vcmask 482304   ;;  %vm370_vm10 = vcmask 261120   ;;  %vm372_vm11 = vcmask 392192   ;;  %vm478_vm12 = vcmask 220160   ;;  %s1285_s9 = smov 90   ;;  %s1286_s10 = smov 119  }
  0x11   : > { %v346_v15 = vrot.slane %v342_v13, %v1395_v12  ;;  %v336_v24 = vrot.slane %v332_v19, %v1395_v12  ;;  %vm500_vm13 = vcmask 1043456  }
  0x13   : > { %311 = vrot.lane.b32.xlu0 %v308_v1, %s1264_s11  ;;  %vm1407_vm3 = vcmp.eq.s32.totalorder %v346_v15, 1  ;;  %vm1425_vm7 = vcmp.eq.s32.totalorder %v336_v24, 1 }
  0x81   : > { %v310_v3 = vpop.permute.xlu0 %309 }
  0x82   : > { %v317_v7 = vsel %vm313_vm0, 0.0, %v310_v3 }
  0x85   : > { %v312_v4 = vpop.permute.xlu0 %311 }
  0x86   : > { %v314_v5 = vsel %vm313_vm0, %v310_v3, %v312_v4  ;;  %v318_v6 = vsel %vm313_vm0, %v312_v4, 0.0 }
  0x87   : > { %393 = vrot.lane.b32.xlu0 %v314_v5, %s1266_s12  ;;  %351 = vrot.lane.b32.xlu1 %v314_v5, %s1267_s13 }
  0x8b   : > { %419 = vrot.lane.b32.xlu0 %v314_v5, %s1268_s14  ;;  %451 = vrot.lane.b32.xlu1 %v318_v6, %s1267_s13 }
  0x8f   : > { %338 = vrot.lane.b32.xlu0 %v314_v5, %s1269_s15  ;;  %395 = vrot.lane.b32.xlu1 %v318_v6, %s1266_s12  ;;  %s1287_s12 = smov 118   ;;  %s1288_s15 = smov 122  }
  0x93   : > { %405 = vrot.lane.b32.xlu0 %v317_v7, %s1270_s16  ;;  %378 = vrot.lane.b32.xlu1 %v314_v5, %s1271_s17  ;;  %s1290_s17 = smov 94  }
  0x97   : > { %467 = vrot.lane.b32.xlu0 %v317_v7, %s1272_s18  ;;  %349 = vrot.lane.b32.xlu1 %v317_v7, %s1267_s13  ;;  %s1282_s13 = smov 32  }
  0x9b   : > { %415 = vrot.lane.b32.xlu0 %v317_v7, %s1268_s14  ;;  %476 = vrot.lane.b32.xlu1 %v317_v7, %s1273_s19 }
  0x9f   : > { %386 = vrot.lane.b32.xlu0 %v317_v7, %s1274_s20  ;;  %365 = vrot.lane.b32.xlu1 %v317_v7, %s1275_s21 }
  0xa3   : > { %461 = vrot.lane.b32.xlu0 %v314_v5, %s1275_s21  ;;  %436 = vrot.lane.b32.xlu1 %v317_v7, %s1276_s22 }
  0xa7   : > { %407 = vrot.lane.b32.xlu0 %v314_v5, %s1270_s16  ;;  %423 = vrot.lane.b32.xlu1 %v317_v7, %s1278_s23 }
  0xab   : > { %470 = vrot.lane.b32.xlu0 %v314_v5, %s1274_s20  ;;  %430 = vrot.lane.b32.xlu1 %v314_v5, %s1273_s19 }
  0xaf   : > { %445 = vrot.lane.b32.xlu0 %v314_v5, %s1278_s23  ;;  %481 = vrot.lane.b32.xlu1 %v318_v6, %s1270_s16  ;;  %s1289_s16 = smov 104  }
  0xb3   : > { %439 = vrot.lane.b32.xlu1 %v314_v5, %s1279_s24 }
  0xb7   : > { %374 = vrot.lane.b32.xlu1 %v314_v5, %s1280_s25  ;;  %s1291_s25 = smov 95  }
  0xbb   : > { %328 = vrot.lane.b32.xlu1 %v314_v5, %s1281_s26 }
  0xf9   : > { %v394_v16 = vpop.permute.xlu0 %393  ;;  %v352_v17 = vpop.permute.xlu1 %351 }
  0xfd   : > { %v420_v20 = vpop.permute.xlu0 %419  ;;  %v452_v21 = vpop.permute.xlu1 %451 }
  0xfe   : > { %v422_v22 = vsel %vm1407_vm3, %v420_v20, 0.0  ;;  %v453_v23 = vsel %vm353_vm4, %v352_v17, %v452_v21 }
  0xff   : > { %427 = vrot.lane.b32.xlu0 %v422_v22, %s1282_s13  ;;  %v455_v27 = vsel %vm1407_vm3, %v453_v23, 0.0 }
 0x101   : > { %v339_v25 = vpop.permute.xlu0 %338  ;;  %v396_v26 = vpop.permute.xlu1 %395 }
 0x102   : > { %v398_v29 = vsel %vm397_vm5, %v394_v16, %v396_v26  ;;  %v1438_v36 = vsel %vm1425_vm7, %v339_v25, 0.0  ;;  %vm589_vm5 = vcmask 523264  }
 0x103   : > { %458 = vrot.lane.b32.xlu0 %v455_v27, %s1282_s13  ;;  %v400_v33 = vsel %vm1425_vm7, %v398_v29, 0.0 }
 0x105   : > { %v406_v30 = vpop.permute.xlu0 %405  ;;  %v379_v31 = vpop.permute.xlu1 %378 }
 0x106   : > { %v381_v32 = vsel %vm1425_vm7, %v379_v31, 0.0 }
 0x107   : > { %402 = vrot.lane.b32.xlu0 %v400_v33, %s1281_s26  ;;  %383 = vrot.lane.b32.xlu1 %v381_v32, %s1281_s26 }
 0x109   : > { %v468_v34 = vpop.permute.xlu0 %467  ;;  %v350_v35 = vpop.permute.xlu1 %349 }
 0x10a   : > { %v473_v37 = vsel %vm368_vm8, %v406_v30, %v468_v34  ;;  %v354_v38 = vsel %vm353_vm4, %v350_v35, %v352_v17  ;;  %v322_v17 = vsel %vm321_vm14, 1, %v1265_v2  ;;  %vm512_vm4 = vcmask 293888  }
 0x10b   : > { %358 = vrot.lane.b32.xlu1 %v1438_v36, %s1281_s26  ;;  %v356_v39 = vsel %vm1407_vm3, %v354_v38, 0.0  ;;  %v326_v23 = vrot.slane %v322_v17, %v1395_v12 }
 0x10c   : > { %362 = vrot.lane.b32.xlu0 %v356_v39, %s1282_s13  ;;  %v464_v40 = vsel %vm368_vm8, %v356_v39, %v406_v30 }
 0x10d   : > { %v416_v42 = vpop.permute.xlu0 %415  ;;  %v477_v43 = vpop.permute.xlu1 %476  ;;  %vm1486_vm15 = vcmp.eq.s32.totalorder %v326_v23, 1 }
 0x10e   : > { %v418_v48 = vsel %vm1407_vm3, %v416_v42, 0.0 }
 0x10f   : > { %509 = vperm.xlu1 %1245, %v506_v41  }
 0x111   : > { %v387_v44 = vpop.permute.xlu0 %386  ;;  %v1451_v45 = vpop.permute.xlu1 %365 }
 0x115   : > { %v462_v46 = vpop.permute.xlu0 %461  ;;  %v437_v47 = vpop.permute.xlu1 %436 }
 0x116   : > { %v474_v54 = vsel %vm370_vm10, %v473_v37, %v462_v46  ;;  %v448_v0 = vsel %vm368_vm8, %v437_v47, %v1451_v45 }
 0x119   : > { %v408_v49 = vpop.permute.xlu0 %407  ;;  %v424_v50 = vpop.permute.xlu1 %423 }
 0x11a   : > { %v410_v51 = vsel %vm409_vm9, %v406_v30, %v408_v49  ;;  %v433_v52 = vsel %vm368_vm8, %v418_v48, %v424_v50  ;;  %v442_v53 = vsel %vm368_vm8, %v424_v50, %v437_v47 }
 0x11d   : > { %v471_v55 = vpop.permute.xlu0 %470  ;;  %v431_v56 = vpop.permute.xlu1 %430 }
 0x11e   : > { %v475_v57 = vsel %vm372_vm11, %v474_v54, %v471_v55  ;;  %v479_v58 = vsel %vm478_vm12, %v477_v43, %v431_v56  ;;  %v443_v6 = vsel %vm370_vm10, %v442_v53, %v431_v56  ;;  %vm654_vm12 = vcmp.le.s32.totalorder %v1389_v10, 2 }
 0x11f   : > { %v485_v59 = vsel %vm368_vm8, %v468_v34, %v479_v58  ;;  %v498_v22 = vrot.slane %v475_v57, 4 }
 0x120   : > { %v486_v62 = vsel %vm370_vm10, %v485_v59, %v471_v55 }
 0x121   : > { %v482_v60 = vpop.permute.xlu1 %481  ;;  %v446_v3 = vpop.permute.xlu0 %445 }
 0x122   : > { %v483_v61 = vsel %vm409_vm9, %v408_v49, %v482_v60  ;;  %v505_v49 = vld [vmem:[%s1727_s2] sm:$0xff]  ;;  %vm723_vm9 = vcmp.le.s32.totalorder %v1403_v14, 2 }
 0x123   : > { %v487_v63 = vsel %vm372_vm11, %v486_v62, %v483_v61  ;;  %vm724_vm14 = vmand %vm723_vm9, %vm320_vm1 }
 0x124   : > { %1145 = vmatpush3.msk.msra.mxu0 %vm500_vm13, %v487_v63 }
 0x125   : > { %v440_v1 = vpop.permute.xlu1 %439  ;;  %1146 = vmatprep.subr.mxu0 %v1277_v8 }
 0x126   : > { %v449_v4 = vsel %vm370_vm10, %v448_v0, %v440_v1  ;;  %v444_v9 = vsel %vm372_vm11, %v443_v6, %v440_v1 }
 0x127   : > { %v450_v5 = vsel %vm372_vm11, %v449_v4, %v446_v3 }
 0x128   : > { %v495_v7 = vrot.slane %v450_v5, 4 }
 0x129   : > { %v375_v15 = vpop.permute.xlu1 %374 }
 0x12a   : > { %v503_v13 = vsel %vm500_vm13, %v444_v9, %v495_v7  ;;  %v377_v29 = vsel %vm1425_vm7, %v375_v15, 0.0  ;;  %v735_v7 = vsel %vm723_vm9, 1, %v1265_v2  ;;  %v666_v9 = vsel %vm654_vm12, 1, %v1265_v2 }
 0x12b   : > { %v670_v15 = vrot.slane %v666_v9, %v1395_v12 }
 0x12d   : > { %v329_v19 = vpop.permute.xlu1 %328 }
 0x171   : > { %v428_v16 = vpop.permute.xlu0 %427 }
 0x172   : > { %v434_v20 = vsel %vm370_vm10, %v433_v52, %v428_v16 }
 0x173   : > { %v435_v26 = vsel %vm372_vm11, %v434_v20, %v431_v56 }
 0x174   : > { %v492_v35 = vrot.slane %v435_v26, 4 }
 0x175   : > { %v459_v21 = vpop.permute.xlu0 %458 }
 0x176   : > { %v465_v24 = vsel %vm370_vm10, %v464_v40, %v459_v21  ;;  %v725_v21 = vsel %vm724_vm14, 1, %v1265_v2 }
 0x177   : > { %v466_v25 = vsel %vm372_vm11, %v465_v24, %v462_v46 }
 0x178   : > { %v504_v27 = vsel %vm500_vm13, %v466_v25, %v498_v22 }
 0x179   : > { %v403_v30 = vpop.permute.xlu0 %402  ;;  %1147 = vmatpush3.msra.mxu0 %v504_v27  ;;  %v384_v31 = vpop.permute.xlu1 %383  ;;  %v729_v27 = vrot.slane %v725_v21, %v1395_v12 }
 0x17a   : > { %v412_v33 = vsel %vm368_vm8, %v1438_v36, %v403_v30  ;;  %v389_v34 = vsel %vm368_vm8, %v377_v29, %v384_v31  ;;  %1148 = vmatprep.subr.mxu0 %v1277_v8  ;;  %v331_v36 = vsel %vm1486_vm15, %v329_v19, 0.0  ;;  %v948_v19 = vld [vmem:[%s1731_s6] sm:$0xff] }
 0x17b   : > { %v413_v37 = vsel %vm370_vm10, %v412_v33, %v387_v44  ;;  %v390_v38 = vsel %vm370_vm10, %v389_v34, %v1451_v45  ;;  %1149 = vmatpush3.msra.mxu0 %v503_v13  ;;  %v739_v13 = vrot.slane %v735_v7, %v1395_v12 }
 0x17c   : > { %v391_v39 = vsel %vm372_vm11, %v390_v38, %v387_v44  ;;  %1150 = vmatprep.subr.mxu0 %v1277_v8  ;;  %v414_v40 = vsel %vm372_vm11, %v413_v37, %v410_v51 }
 0x17d   : > { %v359_v41 = vpop.permute.xlu1 %358  ;;  %v502_v42 = vsel %vm500_vm13, %v414_v40, %v492_v35  ;;  %v489_v48 = vrot.slane %v391_v39, 4 }
 0x17e   : > { %v369_v43 = vsel %vm368_vm8, %v331_v36, %v359_v41  ;;  %v363_v46 = vpop.permute.xlu0 %362  ;;  %1151 = vmatpush3.msra.mxu0 %v502_v42 }
 0x17f   : > { %v371_v47 = vsel %vm370_vm10, %v369_v43, %v363_v46  ;;  %1152 = vmatprep.subr.mxu0 %v1277_v8 }
 0x180   : > { %v373_v44 = vsel %vm372_vm11, %v371_v47, %v1451_v45 }
 0x181   : > { %v501_v50 = vsel %vm500_vm13, %v373_v44, %v489_v48  ;;  %vm772_vm13 = vmand %vm723_vm9, %vm654_vm12  ;;  %vm1587_vm9 = vcmp.eq.s32.totalorder %v729_v27, 1 }
 0x182   : > { %1153 = vmatpush3.msra.mxu0 %v501_v50  ;;  %v773_v16 = vsel %vm772_vm13, 1, %v1265_v2  ;;  %vm655_vm13 = vmand %vm319_vm2, %vm654_vm12  ;;  %vm806_vm12 = vcmask 588800  }
 0x183   : > { %1155 = vmatmul.mubr.msk.f32.vlgmr.msra.gmra.mxu0 %vm512_vm4, %v505_v49  ;;  %1178 = vmatprep.subr.mxu0 %v1277_v8  ;;  %vm1563_vm4 = vcmp.eq.s32.totalorder %v739_v13, 1  ;;  %v777_v20 = vrot.slane %v773_v16, %v1395_v12  ;;  %v656_v46 = vsel %vm655_vm13, 1, %v1265_v2  ;;  %v800_v49 = vld [vmem:[%s1730_s5] sm:$0xff] }
 0x184   : > { %1196 = vmatprep.mubr.msk.f32.mxu0 %vm1283_vm6, %v1277_v8  ;;  %vm611_vm6 = vcmask 564224   ;;  %v660_v14 = vrot.slane %v656_v46, %v1395_v12  ;;  %v799_v46 = vld [vmem:[%s1729_s4] sm:$0xff] }
 0x185   : > { %vm1579_vm1 = vcmp.eq.s32.totalorder %v777_v20, 1 }
 0x186   : > { %vm1620_vm2 = vcmp.eq.s32.totalorder %v660_v14, 1 }
 0x18a   : > { %v510_v51 = vpop.permute.xlu1 %509 }
 0x243   : > { %v585_v52 = vpop.f32.mrf.mxu0 }
 0x244   : > { %v586_v53 = vadd.f32 %v585_v52, %v510_v51 }
 0x245   : > { %v1156_v54 = vpop.f32.mrf.mxu0 }
 0x246   : > { %v590_v45 = vsel %vm589_vm5, %v586_v53, 0.0 }
 0x247   : > { %591 = vadd.xlane.f32.xlu0 %v590_v45 }
 0x2d0   : > { %v592_v55 = vpop.xlane.xlu0 %591 }
 0x2d1   : > { %v594_v56 = vmul.f32 0.015625, %v592_v55 }
 0x2d3   : > { %v595_v57 = vsub.f32 %v586_v53, %v594_v56 }
 0x2d5   : > { %v596_v58 = vmul.f32 %v595_v57, %v595_v57 }
 0x2d7   : > { %v597_v59 = vsel %vm589_vm5, %v596_v58, 0.0 }
 0x2d8   : > { %598 = vadd.xlane.f32.xlu1 %v597_v59 }
 0x361   : > { %v599_v60 = vpop.xlane.xlu1 %598 }
 0x362   : > { %v600_v61 = vmul.f32 0.015625, %v599_v60 }
 0x364   : > { %v601_v62 = vadd.f32 1e-05, %v600_v61 }
 0x366   : > { %1248 = vrsqrt.f32 %v601_v62 }
 0x373   : > { %v1249_v63 = vpop.eup %1248 }
 0x374   : > { %v603_v0 = vmul.f32 %v1249_v63, %v595_v57 }
 0x376   : > { %v604_v1 = vmul.f32 0.2, %v603_v0 }
 0x378   : > { %v605_v3 = vmax.f32 %v603_v0, %v604_v1 }
 0x37a   : > { %607 = vrot.lane.b32.xlu0 %v605_v3, %s1264_s11 }
 0x3ec   : > { %v608_v4 = vpop.permute.xlu0 %607 }
 0x3ed   : > { %v610_v5 = vsel %vm313_vm0, 0.0, %v608_v4 }
 0x3ee   : > { %v1519_v6 = vsel %vm611_vm6, %v610_v5, 0.0  ;;  %vm1567_vm6 = vcmp.eq.s32.totalorder %v670_v15, 1 }
 0x3ef   : > { %756 = vrot.lane.b32.xlu0 %v1519_v6, %s1284_s30  ;;  %706 = vrot.lane.b32.xlu1 %v1519_v6, %s1285_s9  ;;  %s1292_s30 = smov 79   ;;  %s1293_s9 = smov 108  }
 0x3f3   : > { %741 = vrot.lane.b32.xlu0 %v1519_v6, %s1286_s10  ;;  %779 = vrot.lane.b32.xlu1 %v1519_v6, %s1287_s12 }
 0x3f7   : > { %672 = vrot.lane.b32.xlu0 %v1519_v6, %s1288_s15  ;;  %731 = vrot.lane.b32.xlu1 %v1519_v6, %s1289_s16  ;;  %s1299_s16 = smov 124  }
 0x3fb   : > { %662 = vrot.lane.b32.xlu0 %v1519_v6, %s1290_s17  ;;  %690 = vrot.lane.b32.xlu1 %v1519_v6, %s1268_s14  ;;  %s1294_s14 = smov 80   ;;  %s1300_s17 = smov 127  }
 0x3ff   : > { %618 = vrot.lane.b32.xlu0 %v1519_v6, %s1291_s25  ;;  %640 = vrot.lane.b32.xlu1 %v1519_v6, %s1292_s30 }
 0x403   : > { %783 = vrot.lane.b32.xlu0 %v1519_v6, %s1274_s20  ;;  %622 = vrot.lane.b32.xlu1 %v1519_v6, %s1293_s9  ;;  %s303_s9 = scalar_lea.vmem %s1733_s8, %s1117_s29 }
 0x407   : > { %760 = vrot.lane.b32.xlu0 %v1519_v6, %s1275_s21  ;;  %648 = vrot.lane.b32.xlu1 %v1519_v6, %s1273_s19  ;;  %s1295_s19 = smov 48  }
 0x40b   : > { %710 = vrot.lane.b32.xlu0 %v1519_v6, %s1276_s22 }
 0x40f   : > { %680 = vrot.lane.b32.xlu0 %v1519_v6, %s1279_s24  ;;  %s1296_s24 = smov 96  }
 0x413   : > { %701 = vrot.lane.b32.xlu0 %v1519_v6, %s1278_s23 }
 0x417   : > { %614 = vrot.lane.b32.xlu0 %v1519_v6, %s1294_s14 }
 0x461   : > { %v757_v22 = vpop.permute.xlu0 %756  ;;  %v707_v23 = vpop.permute.xlu1 %706 }
 0x462   : > { %v759_v24 = vsel %vm1563_vm4, %v757_v22, 0.0  ;;  %v709_v25 = vsel %vm1567_vm6, %v707_v23, 0.0 }
 0x463   : > { %789 = vrot.lane.b32.xlu0 %v759_v24, %s1282_s13  ;;  %786 = vrot.lane.b32.xlu1 %v709_v25, %s1281_s26 }
 0x465   : > { %v742_v29 = vpop.permute.xlu0 %741  ;;  %v780_v30 = vpop.permute.xlu1 %779 }
 0x466   : > { %v782_v31 = vsel %vm1579_vm1, %v780_v30, 0.0  ;;  %v744_v37 = vsel %vm1563_vm4, %v742_v29, 0.0 }
 0x467   : > { %793 = vrot.lane.b32.xlu1 %v782_v31, %s1295_s19 }
 0x469   : > { %v673_v34 = vpop.permute.xlu0 %672  ;;  %v732_v35 = vpop.permute.xlu1 %731 }
 0x46a   : > { %v734_v38 = vsel %vm1587_vm9, %v732_v35, 0.0  ;;  %v675_v41 = vsel %vm1567_vm6, %v673_v34, 0.0 }
 0x46b   : > { %763 = vrot.lane.b32.xlu1 %v744_v37, %s1282_s13  ;;  %746 = vrot.lane.b32.xlu0 %v734_v38, %s1282_s13 }
 0x46d   : > { %v663_v39 = vpop.permute.xlu0 %662  ;;  %v691_v40 = vpop.permute.xlu1 %690 }
 0x46e   : > { %v693_v47 = vsel %vm1407_vm3, %v691_v40, 0.0  ;;  %v665_v2 = vsel %vm1620_vm2, %v663_v39, 0.0 }
 0x46f   : > { %767 = vrot.lane.b32.xlu1 %v759_v24, %s1295_s19  ;;  %750 = vrot.lane.b32.xlu0 %v744_v37, %s1295_s19 }
 0x471   : > { %v641_v36 = vpop.permute.xlu1 %640  ;;  %v619_v43 = vpop.permute.xlu0 %618 }
 0x472   : > { %v1607_v42 = vsel %vm1425_vm7, %v641_v36, 0.0  ;;  %v621_v10 = vsel %vm1425_vm7, %v619_v43, 0.0 }
 0x473   : > { %713 = vrot.lane.b32.xlu1 %v675_v41, %s1281_s26  ;;  %645 = vrot.lane.b32.xlu0 %v1607_v42, %s1281_s26 }
 0x475   : > { %v623_v12 = vpop.permute.xlu1 %622  ;;  %v784_v50 = vpop.permute.xlu0 %783 }
 0x476   : > { %v625_v44 = vsel %vm1407_vm3, %v623_v12, 0.0 }
 0x477   : > { %717 = vrot.lane.b32.xlu1 %v709_v25, %s1295_s19  ;;  %627 = vrot.lane.b32.xlu0 %v621_v10, %s1281_s26 }
 0x479   : > { %v761_v51 = vpop.permute.xlu0 %760  ;;  %v649_v45 = vpop.permute.xlu1 %648 }
 0x47b   : > { %695 = vrot.lane.b32.xlu1 %v693_v47, %s1282_s13  ;;  %634 = vrot.lane.b32.xlu0 %v1519_v6, %s1272_s18 }
 0x47d   : > { %v711_v52 = vpop.permute.xlu0 %710 }
 0x47e   : > { %v753_v4 = vsel %vm368_vm8, %v693_v47, %v711_v52 }
 0x47f   : > { %677 = vrot.lane.b32.xlu1 %v665_v2, %s1281_s26  ;;  %s1297_s26 = smov 112  }
 0x481   : > { %v681_v53 = vpop.permute.xlu0 %680 }
 0x482   : > { %v698_v21 = vsel %vm368_vm8, %v625_v44, %v681_v53 }
 0x483   : > { %684 = vrot.lane.b32.xlu1 %v675_v41, %s1295_s19 }
 0x485   : > { %v702_v54 = vpop.permute.xlu0 %701 }
 0x487   : > { %631 = vrot.lane.b32.xlu1 %v625_v44, %s1282_s13  ;;  %s1298_s13 = smov 120  }
 0x489   : > { %v615_v55 = vpop.permute.xlu0 %614 }
 0x48a   : > { %v617_v39 = vsel %vm1486_vm15, %v615_v55, 0.0 }
 0x48b   : > { %803 = vperm.xlu1 %1245, %v800_v49  }
 0x4d5   : > { %v787_v56 = vpop.permute.xlu1 %786  ;;  %v790_v57 = vpop.permute.xlu0 %789 }
 0x4d6   : > { %v796_v58 = vsel %vm368_vm8, %v784_v50, %v787_v56 }
 0x4d7   : > { %v797_v60 = vsel %vm370_vm10, %v796_v58, %v790_v57 }
 0x4d9   : > { %v794_v59 = vpop.permute.xlu1 %793 }
 0x4da   : > { %v798_v61 = vsel %vm372_vm11, %v797_v60, %v794_v59 }
 0x4db   : > { %1158 = vmatpush3.msra.mxu1 %v798_v61 }
 0x4dc   : > { %1159 = vmatprep.subr.mxu1 %v1277_v8 }
 0x4dd   : > { %v747_v62 = vpop.permute.xlu0 %746  ;;  %v764_v63 = vpop.permute.xlu1 %763 }
 0x4de   : > { %v770_v0 = vsel %vm370_vm10, %v761_v51, %v764_v63  ;;  %v754_v6 = vsel %vm370_vm10, %v753_v4, %v747_v62 }
 0x4e1   : > { %v751_v1 = vpop.permute.xlu0 %750  ;;  %v768_v3 = vpop.permute.xlu1 %767 }
 0x4e2   : > { %v771_v5 = vsel %vm372_vm11, %v770_v0, %v768_v3  ;;  %v755_v7 = vsel %vm372_vm11, %v754_v6, %v751_v1  ;;  %v949_v6 = vld [vmem:[%s1732_s7] sm:$0xff] }
 0x4e3   : > { %1160 = vmatpush3.msra.mxu1 %v771_v5 }
 0x4e4   : > { %1161 = vmatprep.subr.mxu1 %v1277_v8 }
 0x4e5   : > { %1162 = vmatpush3.msra.mxu1 %v755_v7  ;;  %v714_v9 = vpop.permute.xlu1 %713  ;;  %v646_v23 = vpop.permute.xlu0 %645 }
 0x4e6   : > { %v720_v13 = vsel %vm368_vm8, %v711_v52, %v714_v9  ;;  %1163 = vmatprep.subr.mxu1 %v1277_v8  ;;  %v651_v29 = vsel %vm368_vm8, %v621_v10, %v646_v23 }
 0x4e7   : > { %v721_v16 = vsel %vm370_vm10, %v720_v13, %v711_v52  ;;  %v652_v37 = vsel %vm370_vm10, %v651_v29, %v649_v45 }
 0x4e8   : > { %v653_v40 = vsel %vm372_vm11, %v652_v37, %v649_v45 }
 0x4e9   : > { %v718_v15 = vpop.permute.xlu1 %717  ;;  %v628_v31 = vpop.permute.xlu0 %627 }
 0x4ea   : > { %v722_v20 = vsel %vm372_vm11, %v721_v16, %v718_v15  ;;  %v637_v36 = vsel %vm368_vm8, %v617_v39, %v628_v31 }
 0x4eb   : > { %1164 = vmatpush3.msra.mxu1 %v722_v20 }
 0x4ec   : > { %1165 = vmatprep.subr.mxu1 %v1277_v8 }
 0x4ed   : > { %1166 = vmatpush3.msra.mxu1 %v702_v54  ;;  %v696_v22 = vpop.permute.xlu1 %695 }
 0x4ee   : > { %v699_v24 = vsel %vm370_vm10, %v698_v21, %v696_v22  ;;  %1167 = vmatprep.subr.mxu1 %v1277_v8 }
 0x4ef   : > { %v700_v25 = vsel %vm372_vm11, %v699_v24, %v681_v53 }
 0x4f0   : > { %1168 = vmatpush3.msra.mxu1 %v700_v25 }
 0x4f1   : > { %v678_v27 = vpop.permute.xlu1 %677  ;;  %1169 = vmatprep.subr.mxu1 %v1277_v8 }
 0x4f2   : > { %v687_v30 = vsel %vm368_vm8, %v1607_v42, %v678_v27  ;;  %v635_v42 = vpop.permute.xlu0 %634 }
 0x4f3   : > { %v688_v35 = vsel %vm370_vm10, %v687_v30, %v681_v53 }
 0x4f5   : > { %v685_v34 = vpop.permute.xlu1 %684 }
 0x4f6   : > { %v689_v38 = vsel %vm372_vm11, %v688_v35, %v685_v34 }
 0x4f7   : > { %1170 = vmatpush3.msra.mxu1 %v689_v38 }
 0x4f8   : > { %1171 = vmatprep.subr.mxu1 %v1277_v8 }
 0x4f9   : > { %1172 = vmatpush3.msra.mxu1 %v653_v40  ;;  %v632_v41 = vpop.permute.xlu1 %631 }
 0x4fa   : > { %v638_v43 = vsel %vm370_vm10, %v637_v36, %v632_v41  ;;  %1173 = vmatprep.subr.mxu1 %v1277_v8  ;;  %vm913_vm10 = vcmask 171008  }
 0x4fb   : > { %v639_v10 = vsel %vm372_vm11, %v638_v43, %v635_v42 }
 0x4fc   : > { %1174 = vmatpush3.msra.mxu1 %v639_v10 }
 0x4fd   : > { %1176 = vmatmul.mubr.msk.f32.vlgmr.msra.gmra.mxu1 %vm806_vm12, %v799_v46 }
 0x506   : > { %v804_v14 = vpop.permute.xlu1 %803 }
 0x5bd   : > { %v876_v47 = vpop.f32.mrf.mxu1 }
 0x5be   : > { %v877_v2 = vadd.f32 %v876_v47, %v804_v14 }
 0x5bf   : > { %v1177_v12 = vpop.f32.mrf.mxu1 }
 0x5c0   : > { %v880_v44 = vsel %vm589_vm5, %v877_v2, 0.0 }
 0x5c1   : > { %881 = vadd.xlane.f32.xlu0 %v880_v44 }
 0x64a   : > { %v882_v49 = vpop.xlane.xlu0 %881 }
 0x64b   : > { %v883_v50 = vmul.f32 0.015625, %v882_v49 }
 0x64d   : > { %v884_v51 = vsub.f32 %v877_v2, %v883_v50 }
 0x64f   : > { %v885_v52 = vmul.f32 %v884_v51, %v884_v51 }
 0x651   : > { %v886_v53 = vsel %vm589_vm5, %v885_v52, 0.0 }
 0x652   : > { %887 = vadd.xlane.f32.xlu1 %v886_v53 }
 0x6db   : > { %v888_v54 = vpop.xlane.xlu1 %887 }
 0x6dc   : > { %v889_v45 = vmul.f32 0.015625, %v888_v54 }
 0x6de   : > { %v890_v55 = vadd.f32 1e-05, %v889_v45 }
 0x6e0   : > { %1250 = vrsqrt.f32 %v890_v55 }
 0x6ed   : > { %v1251_v56 = vpop.eup %1250 }
 0x6ee   : > { %v892_v57 = vmul.f32 %v1251_v56, %v884_v51 }
 0x6f0   : > { %v893_v58 = vmul.f32 0.2, %v892_v57 }
 0x6f2   : > { %v894_v59 = vmax.f32 %v892_v57, %v893_v58 }
 0x6f4   : > { %900 = vrot.lane.b32.xlu1 %v894_v59, %s1296_s24  ;;  %896 = vrot.lane.b32.xlu0 %v894_v59, %s1297_s26 }
 0x6f8   : > { %904 = vrot.lane.b32.xlu0 %v894_v59, %s1294_s14 }
 0x766   : > { %v897_v60 = vpop.permute.xlu0 %896  ;;  %v901_v62 = vpop.permute.xlu1 %900 }
 0x767   : > { %v899_v61 = vmax.f32 %v894_v59, %v897_v60 }
 0x769   : > { %v903_v63 = vmax.f32 %v899_v61, %v901_v62 }
 0x76a   : > { %v905_v0 = vpop.permute.xlu0 %904 }
 0x76b   : > { %v907_v1 = vmax.f32 %v903_v63, %v905_v0 }
 0x76d   : > { %909 = vrot.lane.b32.xlu1 %v907_v1, %s1264_s11  ;;  %s1301_s11 = smov 126  }
 0x7df   : > { %v910_v3 = vpop.permute.xlu1 %909 }
 0x7e0   : > { %v912_v4 = vsel %vm313_vm0, 0.0, %v910_v3  ;;  %vm1039_vm0 = vcmp.lt.s32.totalorder %v1391_v11, 4 }
 0x7e1   : > { %v914_v5 = vsel %vm913_vm10, %v912_v4, 0.0 }
 0x7e2   : > { %937 = vrot.lane.b32.xlu1 %v914_v5, %s1286_s10  ;;  %941 = vrot.lane.b32.xlu0 %v914_v5, %s1287_s12 }
 0x7e6   : > { %929 = vrot.lane.b32.xlu1 %v914_v5, %s1288_s15  ;;  %933 = vrot.lane.b32.xlu0 %v914_v5, %s1298_s13 }
 0x7ea   : > { %925 = vrot.lane.b32.xlu1 %v914_v5, %s1299_s16  ;;  %945 = vrot.lane.b32.xlu0 %v914_v5, %s1278_s23 }
 0x7ee   : > { %917 = vrot.lane.b32.xlu1 %v914_v5, %s1300_s17  ;;  %921 = vrot.lane.b32.xlu0 %v914_v5, %s1301_s11 }
 0x7f2   : > { %952 = vperm.xlu0 %1246, %v949_v6  }
 0x854   : > { %v938_v7 = vpop.permute.xlu1 %937  ;;  %v942_v9 = vpop.permute.xlu0 %941 }
 0x855   : > { %1179 = vmatpush3.msk.msra.mxu0 %vm1579_vm1, %v942_v9 }
 0x856   : > { %1180 = vmatprep.subr.mxu0 %v1277_v8 }
 0x857   : > { %1181 = vmatpush3.msk.msra.mxu0 %vm1563_vm4, %v938_v7 }
 0x858   : > { %v930_v13 = vpop.permute.xlu1 %929  ;;  %1182 = vmatprep.subr.mxu0 %v1277_v8  ;;  %v934_v15 = vpop.permute.xlu0 %933 }
 0x859   : > { %1183 = vmatpush3.msk.msra.mxu0 %vm1587_vm9, %v934_v15 }
 0x85a   : > { %1184 = vmatprep.subr.mxu0 %v1277_v8 }
 0x85b   : > { %1185 = vmatpush3.msk.msra.mxu0 %vm1567_vm6, %v930_v13 }
 0x85c   : > { %v926_v16 = vpop.permute.xlu1 %925  ;;  %1186 = vmatprep.subr.mxu0 %v1277_v8  ;;  %v946_v26 = vpop.permute.xlu0 %945 }
 0x85d   : > { %1187 = vmatpush3.msra.mxu0 %v946_v26 }
 0x85e   : > { %1188 = vmatprep.subr.mxu0 %v1277_v8 }
 0x85f   : > { %1189 = vmatpush3.msk.msra.mxu0 %vm1407_vm3, %v926_v16 }
 0x860   : > { %1190 = vmatprep.subr.mxu0 %v1277_v8  ;;  %v922_v17 = vpop.permute.xlu0 %921  ;;  %v918_v33 = vpop.permute.xlu1 %917 }
 0x861   : > { %1191 = vmatpush3.msk.msra.mxu0 %vm1620_vm2, %v922_v17 }
 0x862   : > { %1192 = vmatprep.subr.mxu0 %v1277_v8 }
 0x863   : > { %1193 = vmatpush3.msk.msra.mxu0 %vm1425_vm7, %v918_v33 }
 0x864   : > { %1194 = vmatprep.subr.mxu0 %v1277_v8 }
 0x865   : > { %1195 = vmatpush3.msk.msra.mxu0 %vm1486_vm15, %v914_v5 }
 0x866   : > { %1197 = vmatmul.mubr.msk.f32.vlgmr.msra.gmra.mxu0 %vm806_vm12, %v948_v19 }
 0x86d   : > { %v953_v18 = vpop.permute.xlu0 %952 }
 0x926   : > { %v1024_v48 = vpop.f32.mrf.mxu0 }
 0x927   : > { %v1025_v20 = vadd.f32 %v1024_v48, %v953_v18 }
 0x928   : > { %v1198_v21 = vpop.f32.mrf.mxu0 }
 0x929   : > { %v1031_v22 = vand.u32 2147483647, %v1025_v20  ;;  %v1030_v29 = vmax.f32 %v1025_v20, 0.0 }
 0x92b   : > { %v1032_v23 = vsub.f32 0.0, %v1031_v22 }
 0x92d   : > { %v1033_v28 = vmul.f32 1.442695, %v1032_v23 }
 0x92f   : > { %1252 = vpow2.f32 %v1033_v28 }
 0x93c   : > { %v1253_v24 = vpop.eup %1252 }
 0x93d   : > { %v1035_v25 = vadd.f32 1.0, %v1253_v24 }
 0x93f   : > { %1254 = vlog2.f32 %v1035_v25 }
 0x94c   : > { %v1255_v27 = vpop.eup %1254 }
 0x94d   : > { %v1037_v8 = vmul.f32 0.6931472, %v1255_v27 }
 0x94f   : > { %v1038_v32 = vadd.f32 %v1037_v8, %v1030_v29 }
 0x951   : > { %v1040_v30 = vsel %vm1039_vm0, %v1025_v20, %v1038_v32 }
 0x952   : > { %1041 = vst.msk [vmem:[%s303_s9] sm:$0xff] %vm368_vm8, %v1040_v30 }
 0x953 PF: > { %s18_s27 = sadd.s32 1, %s1262_s27  }
 0x954   : > { %p15_p4 = scmp.ge.s32.totalorder %s18_s27, 4  }
 0x956   :  { %17 = sbr.rel (!%p15_p4) target bundleno = 1 (0x1), region = 82 }

</bundles_post_ra>
